<compile_context>
chip_gen: v5e
topology: v5e:2x2
jax: 0.10.0
libtpu: 0.0.40
codegen_flags: <defaults>
</compile_context>

<pallas_src>
import functools
import math

import jax
import jax.numpy as jnp
from jax.experimental import pallas as pl
from jax.experimental.pallas import tpu as pltpu

HIDDEN_NEURONS = [128, 100, 64, 64, 64]
INPUT_SIZE = 128
OUTPUT_SIZE = 1
BN_EPS = 1e-5

LANE = 128      # vreg lane width
SUBLANE = 8     # f32 vreg sublane count
HEAD_PAD = 128  # lane-dense width of the padded output head


def _round_up(n, m):
    return ((n + m - 1) // m) * m


def _pad_feature_dim(d):
    # Keep lane-friendly widths (divisors / multiples of 128) as-is; round
    # awkward widths (e.g. 100) up to a multiple of 128.
    if d % LANE == 0 or LANE % d == 0:
        return d
    return _round_up(d, LANE)


# ----------------------------------------------------------------------------
# Kernel
# ----------------------------------------------------------------------------
def _linear(h, w_ref, b_ref):
    # h: [B, in]; w_ref: [in, out] bf16; b_ref: [1, out] f32.
    # bf16 MXU inputs, f32 accumulation.
    return jnp.dot(h.astype(jnp.bfloat16), w_ref[...],
                   preferred_element_type=jnp.float32) + b_ref[...]


def _batchnorm_train(h, gamma_ref, beta_ref, row_mask, inv_n):
    # Training-mode BatchNorm1d: batch mean / biased batch variance (eps=1e-5).
    # `xc` is hoisted and reused for variance and normalization.
    if row_mask is None:
        mean = jnp.sum(h, axis=0, keepdims=True) * inv_n
        xc = h - mean
        var = jnp.sum(xc * xc, axis=0, keepdims=True) * inv_n
    else:
        mean = jnp.sum(h * row_mask, axis=0, keepdims=True) * inv_n
        xc = h - mean
        var = jnp.sum(xc * xc * row_mask, axis=0, keepdims=True) * inv_n
    scale = jax.lax.rsqrt(var + BN_EPS) * gamma_ref[...]   # [1, F], fused once
    return xc * scale + beta_ref[...]


def chessnet_kernel(
    x_ref,
    # layers[0]: plain Linear
    w0_ref, b0_ref,
    # blocks 1..4: Linear -> ReLU -> BatchNorm1d
    w1_ref, b1_ref, g1_ref, be1_ref,
    w2_ref, b2_ref, g2_ref, be2_ref,
    w3_ref, b3_ref, g3_ref, be3_ref,
    w4_ref, b4_ref, g4_ref, be4_ref,
    # output head: Linear -> Sigmoid (padded 1 -> HEAD_PAD columns)
    wo_ref, bo_ref,
    out_ref,
    *, n_valid, batch_padded,
):
    b_pad = x_ref.shape[0]
    inv_n = 1.0 / float(n_valid)

    if batch_padded:
        rows = jax.lax.broadcasted_iota(jnp.int32, (b_pad, 1), 0)
        row_mask = (rows < n_valid).astype(jnp.float32)
    else:
        row_mask = None

    # layers[0]: Linear(128 -> 128), no activation / BN.
    h = _linear(x_ref[...], w0_ref, b0_ref)

    # Linear -> ReLU -> BatchNorm1d blocks.
    for w_ref, b_ref, g_ref, be_ref in (
        (w1_ref, b1_ref, g1_ref, be1_ref),
        (w2_ref, b2_ref, g2_ref, be2_ref),
        (w3_ref, b3_ref, g3_ref, be3_ref),
        (w4_ref, b4_ref, g4_ref, be4_ref),
    ):
        h = _linear(h, w_ref, b_ref)
        h = jnp.maximum(h, 0.0)
        h = _batchnorm_train(h, g_ref, be_ref, row_mask, inv_n)

    # Output head: [B, 64] x [64, 128] -> lane-dense [B, 128] store
    # (only column 0 is the real logit; the wrapper slices it out).
    logits = _linear(h, wo_ref, bo_ref)
    out_ref[...] = 1.0 / (1.0 + jnp.exp(-logits))   # exp on EUP; exact sigmoid


# ----------------------------------------------------------------------------
# Parameters (synthetic, PyTorch-default-like init) with lane padding.
# ----------------------------------------------------------------------------
def init_params(key):
    """Linear weights ~ U(-1/sqrt(fan_in), 1/sqrt(fan_in)), stored [in, out]
    as bf16; biases / BN gamma / beta f32 and 2-D [1, F].  Feature dims are
    zero-padded (100 -> 128, head 1 -> 128); beta pad = 0 keeps padded
    channels exactly zero, so the padded network equals the original one."""
    dims = [INPUT_SIZE] + list(HIDDEN_NEURONS)
    pdims = [_pad_feature_dim(d) for d in dims]
    keys = jax.random.split(key, len(HIDDEN_NEURONS) + 1)

    def lin(k, fan_in, fan_out, p_in, p_out):
        bound = 1.0 / math.sqrt(fan_in)
        kw, kb = jax.random.split(k)
        w = jax.random.uniform(kw, (fan_in, fan_out), jnp.float32, -bound, bound)
        b = jax.random.uniform(kb, (1, fan_out), jnp.float32, -bound, bound)
        wp = jnp.zeros((p_in, p_out), jnp.float32).at[:fan_in, :fan_out].set(w)
        bp = jnp.zeros((1, p_out), jnp.float32).at[:, :fan_out].set(b)
        return wp.astype(jnp.bfloat16), bp

    params = []
    w0, b0 = lin(keys[0], dims[0], dims[1], pdims[0], pdims[1])
    params += [w0, b0]
    for i in range(1, len(HIDDEN_NEURONS)):
        w, b = lin(keys[i], dims[i], dims[i + 1], pdims[i], pdims[i + 1])
        gamma = jnp.ones((1, pdims[i + 1]), jnp.float32)
        beta = jnp.zeros((1, pdims[i + 1]), jnp.float32)
        params += [w, b, gamma, beta]
    wo, bo = lin(keys[-1], dims[-1], OUTPUT_SIZE, pdims[-1], HEAD_PAD)
    params += [wo, bo]
    return tuple(params)


# ----------------------------------------------------------------------------
# Wrapper
# ----------------------------------------------------------------------------
@jax.jit
def chessnet_forward(x, params):
    batch = x.shape[0]
    b_pad = _round_up(max(batch, SUBLANE), SUBLANE)

    x16 = x.astype(jnp.bfloat16)                  # halve input DMA / VMEM
    if b_pad != batch:
        x16 = jnp.pad(x16, ((0, b_pad - batch), (0, 0)))

    kernel = functools.partial(
        chessnet_kernel, n_valid=batch, batch_padded=(b_pad != batch))

    vmem_spec = pl.BlockSpec(memory_space=pltpu.MemorySpace.VMEM)
    out = pl.pallas_call(
        kernel,
        out_shape=jax.ShapeDtypeStruct((b_pad, HEAD_PAD), jnp.float32),
        in_specs=[vmem_spec] * (1 + len(params)),
        out_specs=vmem_spec,
        compiler_params=pltpu.CompilerParams(
            vmem_limit_bytes=64 * 1024 * 1024),   # safe on v5e/v6e/v7x
    )(x16, *params)

    # Drop batch padding and the padded head columns -> [B, 1].
    return out[:batch, :OUTPUT_SIZE]


# ----------------------------------------------------------------------------
# Pure-JAX reference mirroring the kernel numerics (train-mode BN, bf16 MXU).
# ----------------------------------------------------------------------------
def chessnet_reference(x, params):
    p = list(params)

    def lin(h, w, b):
        return jnp.dot(h.astype(jnp.bfloat16), w,
                       preferred_element_type=jnp.float32) + b

    h = lin(x, p[0], p[1])
    idx = 2
    for _ in range(1, len(HIDDEN_NEURONS)):
        w, b, g, be = p[idx:idx + 4]
        idx += 4
        h = jnp.maximum(lin(h, w, b), 0.0)
        mean = jnp.mean(h, axis=0, keepdims=True)
        xc = h - mean
        var = jnp.mean(xc * xc, axis=0, keepdims=True)
        h = xc * jax.lax.rsqrt(var + BN_EPS) * g + be
    logits = lin(h, p[idx], p[idx + 1])
    return (1.0 / (1.0 + jnp.exp(-logits)))[:, :OUTPUT_SIZE]


if __name__ == "__main__":
    key = jax.random.PRNGKey(0)
    k_params, k_x = jax.random.split(key)

    batch = 128  # fills MXU rows; sublane-aligned (training-mode BN batch)
    x = jax.random.normal(k_x, (batch, INPUT_SIZE), jnp.float32)
    params = init_params(k_params)

    out = jax.block_until_ready(chessnet_forward(x, params))
    assert out.shape == (batch, OUTPUT_SIZE)
    assert bool(jnp.all(jnp.isfinite(out)))

    ref = chessnet_reference(x, params)
    max_err = float(jnp.max(jnp.abs(out - ref)))
    assert jnp.allclose(out, ref, atol=1e-3, rtol=1e-3), max_err

    print("KERNEL_OK")
</pallas_src>

<mosaic_0001>
module attributes {stable_mosaic.version = 11 : i64} {
  func.func @chessnet_kernel(%arg0: memref<128x128xbf16, #tpu.memory_space<vmem>>, %arg1: memref<128x128xbf16, #tpu.memory_space<vmem>>, %arg2: memref<1x128xf32, #tpu.memory_space<vmem>>, %arg3: memref<128x128xbf16, #tpu.memory_space<vmem>>, %arg4: memref<1x128xf32, #tpu.memory_space<vmem>>, %arg5: memref<1x128xf32, #tpu.memory_space<vmem>>, %arg6: memref<1x128xf32, #tpu.memory_space<vmem>>, %arg7: memref<128x64xbf16, #tpu.memory_space<vmem>>, %arg8: memref<1x64xf32, #tpu.memory_space<vmem>>, %arg9: memref<1x64xf32, #tpu.memory_space<vmem>>, %arg10: memref<1x64xf32, #tpu.memory_space<vmem>>, %arg11: memref<64x64xbf16, #tpu.memory_space<vmem>>, %arg12: memref<1x64xf32, #tpu.memory_space<vmem>>, %arg13: memref<1x64xf32, #tpu.memory_space<vmem>>, %arg14: memref<1x64xf32, #tpu.memory_space<vmem>>, %arg15: memref<64x64xbf16, #tpu.memory_space<vmem>>, %arg16: memref<1x64xf32, #tpu.memory_space<vmem>>, %arg17: memref<1x64xf32, #tpu.memory_space<vmem>>, %arg18: memref<1x64xf32, #tpu.memory_space<vmem>>, %arg19: memref<64x128xbf16, #tpu.memory_space<vmem>>, %arg20: memref<1x128xf32, #tpu.memory_space<vmem>>, %arg21: memref<128x128xf32, #tpu.memory_space<vmem>>) attributes {dimension_semantics = [], scalar_prefetch = 0 : i64, scratch_operands = 0 : i64, tpu.core_type = #tpu.core_type<tc>} {
    %c0 = arith.constant 0 : index
    %c0_0 = arith.constant 0 : index
    %0 = vector.load %arg0[%c0, %c0_0] : memref<128x128xbf16, #tpu.memory_space<vmem>>, vector<128x128xbf16>
    %c0_1 = arith.constant 0 : index
    %c0_2 = arith.constant 0 : index
    %1 = vector.load %arg1[%c0_1, %c0_2] : memref<128x128xbf16, #tpu.memory_space<vmem>>, vector<128x128xbf16>
    %cst = arith.constant dense<0.000000e+00> : vector<128x128xf32>
    %2 = tpu.matmul %0, %1, %cst {dimension_numbers = #tpu.dot_dimension_numbers<[1], [0], [0], [1], [0, 0, 1, 1], [], []>} : vector<128x128xbf16>, vector<128x128xbf16>, vector<128x128xf32> -> vector<128x128xf32>
    %c0_3 = arith.constant 0 : index
    %c0_4 = arith.constant 0 : index
    %3 = vector.load %arg2[%c0_3, %c0_4] : memref<1x128xf32, #tpu.memory_space<vmem>>, vector<1x128xf32>
    %4 = vector.broadcast %3 : vector<1x128xf32> to vector<128x128xf32>
    %5 = arith.addf %2, %4 : vector<128x128xf32>
    %6 = arith.truncf %5 : vector<128x128xf32> to vector<128x128xbf16>
    %c0_5 = arith.constant 0 : index
    %c0_6 = arith.constant 0 : index
    %7 = vector.load %arg3[%c0_5, %c0_6] : memref<128x128xbf16, #tpu.memory_space<vmem>>, vector<128x128xbf16>
    %cst_7 = arith.constant dense<0.000000e+00> : vector<128x128xf32>
    %8 = tpu.matmul %6, %7, %cst_7 {dimension_numbers = #tpu.dot_dimension_numbers<[1], [0], [0], [1], [0, 0, 1, 1], [], []>} : vector<128x128xbf16>, vector<128x128xbf16>, vector<128x128xf32> -> vector<128x128xf32>
    %c0_8 = arith.constant 0 : index
    %c0_9 = arith.constant 0 : index
    %9 = vector.load %arg4[%c0_8, %c0_9] : memref<1x128xf32, #tpu.memory_space<vmem>>, vector<1x128xf32>
    %10 = vector.broadcast %9 : vector<1x128xf32> to vector<128x128xf32>
    %11 = arith.addf %8, %10 : vector<128x128xf32>
    %cst_10 = arith.constant 0.000000e+00 : f32
    %12 = vector.broadcast %cst_10 : f32 to vector<128x128xf32>
    %13 = arith.maximumf %11, %12 : vector<128x128xf32>
    %cst_11 = arith.constant dense<0.000000e+00> : vector<128xf32>
    %14 = vector.multi_reduction <add>, %13, %cst_11 [0] : vector<128x128xf32> to vector<128xf32>
    %15 = vector.shape_cast %14 : vector<128xf32> to vector<1x128xf32>
    %cst_12 = arith.constant 7.812500e-03 : f32
    %16 = vector.broadcast %cst_12 : f32 to vector<1x128xf32>
    %17 = arith.mulf %15, %16 : vector<1x128xf32>
    %18 = vector.broadcast %17 : vector<1x128xf32> to vector<128x128xf32>
    %19 = arith.subf %13, %18 : vector<128x128xf32>
    %20 = arith.mulf %19, %19 : vector<128x128xf32>
    %cst_13 = arith.constant dense<0.000000e+00> : vector<128xf32>
    %21 = vector.multi_reduction <add>, %20, %cst_13 [0] : vector<128x128xf32> to vector<128xf32>
    %22 = vector.shape_cast %21 : vector<128xf32> to vector<1x128xf32>
    %cst_14 = arith.constant 7.812500e-03 : f32
    %23 = vector.broadcast %cst_14 : f32 to vector<1x128xf32>
    %24 = arith.mulf %22, %23 : vector<1x128xf32>
    %cst_15 = arith.constant 9.99999974E-6 : f32
    %25 = vector.broadcast %cst_15 : f32 to vector<1x128xf32>
    %26 = arith.addf %24, %25 : vector<1x128xf32>
    %27 = math.rsqrt %26 : vector<1x128xf32>
    %c0_16 = arith.constant 0 : index
    %c0_17 = arith.constant 0 : index
    %28 = vector.load %arg5[%c0_16, %c0_17] : memref<1x128xf32, #tpu.memory_space<vmem>>, vector<1x128xf32>
    %29 = arith.mulf %27, %28 : vector<1x128xf32>
    %30 = vector.broadcast %29 : vector<1x128xf32> to vector<128x128xf32>
    %31 = arith.mulf %19, %30 : vector<128x128xf32>
    %c0_18 = arith.constant 0 : index
    %c0_19 = arith.constant 0 : index
    %32 = vector.load %arg6[%c0_18, %c0_19] : memref<1x128xf32, #tpu.memory_space<vmem>>, vector<1x128xf32>
    %33 = vector.broadcast %32 : vector<1x128xf32> to vector<128x128xf32>
    %34 = arith.addf %31, %33 : vector<128x128xf32>
    %35 = arith.truncf %34 : vector<128x128xf32> to vector<128x128xbf16>
    %c0_20 = arith.constant 0 : index
    %c0_21 = arith.constant 0 : index
    %36 = vector.load %arg7[%c0_20, %c0_21] : memref<128x64xbf16, #tpu.memory_space<vmem>>, vector<128x64xbf16>
    %cst_22 = arith.constant dense<0.000000e+00> : vector<128x64xf32>
    %37 = tpu.matmul %35, %36, %cst_22 {dimension_numbers = #tpu.dot_dimension_numbers<[1], [0], [0], [1], [0, 0, 1, 1], [], []>} : vector<128x128xbf16>, vector<128x64xbf16>, vector<128x64xf32> -> vector<128x64xf32>
    %c0_23 = arith.constant 0 : index
    %c0_24 = arith.constant 0 : index
    %38 = vector.load %arg8[%c0_23, %c0_24] : memref<1x64xf32, #tpu.memory_space<vmem>>, vector<1x64xf32>
    %39 = vector.broadcast %38 : vector<1x64xf32> to vector<128x64xf32>
    %40 = arith.addf %37, %39 : vector<128x64xf32>
    %cst_25 = arith.constant 0.000000e+00 : f32
    %41 = vector.broadcast %cst_25 : f32 to vector<128x64xf32>
    %42 = arith.maximumf %40, %41 : vector<128x64xf32>
    %cst_26 = arith.constant dense<0.000000e+00> : vector<64xf32>
    %43 = vector.multi_reduction <add>, %42, %cst_26 [0] : vector<128x64xf32> to vector<64xf32>
    %44 = vector.shape_cast %43 : vector<64xf32> to vector<1x64xf32>
    %cst_27 = arith.constant 7.812500e-03 : f32
    %45 = vector.broadcast %cst_27 : f32 to vector<1x64xf32>
    %46 = arith.mulf %44, %45 : vector<1x64xf32>
    %47 = vector.broadcast %46 : vector<1x64xf32> to vector<128x64xf32>
    %48 = arith.subf %42, %47 : vector<128x64xf32>
    %49 = arith.mulf %48, %48 : vector<128x64xf32>
    %cst_28 = arith.constant dense<0.000000e+00> : vector<64xf32>
    %50 = vector.multi_reduction <add>, %49, %cst_28 [0] : vector<128x64xf32> to vector<64xf32>
    %51 = vector.shape_cast %50 : vector<64xf32> to vector<1x64xf32>
    %cst_29 = arith.constant 7.812500e-03 : f32
    %52 = vector.broadcast %cst_29 : f32 to vector<1x64xf32>
    %53 = arith.mulf %51, %52 : vector<1x64xf32>
    %cst_30 = arith.constant 9.99999974E-6 : f32
    %54 = vector.broadcast %cst_30 : f32 to vector<1x64xf32>
    %55 = arith.addf %53, %54 : vector<1x64xf32>
    %56 = math.rsqrt %55 : vector<1x64xf32>
    %c0_31 = arith.constant 0 : index
    %c0_32 = arith.constant 0 : index
    %57 = vector.load %arg9[%c0_31, %c0_32] : memref<1x64xf32, #tpu.memory_space<vmem>>, vector<1x64xf32>
    %58 = arith.mulf %56, %57 : vector<1x64xf32>
    %59 = vector.broadcast %58 : vector<1x64xf32> to vector<128x64xf32>
    %60 = arith.mulf %48, %59 : vector<128x64xf32>
    %c0_33 = arith.constant 0 : index
    %c0_34 = arith.constant 0 : index
    %61 = vector.load %arg10[%c0_33, %c0_34] : memref<1x64xf32, #tpu.memory_space<vmem>>, vector<1x64xf32>
    %62 = vector.broadcast %61 : vector<1x64xf32> to vector<128x64xf32>
    %63 = arith.addf %60, %62 : vector<128x64xf32>
    %64 = arith.truncf %63 : vector<128x64xf32> to vector<128x64xbf16>
    %c0_35 = arith.constant 0 : index
    %c0_36 = arith.constant 0 : index
    %65 = vector.load %arg11[%c0_35, %c0_36] : memref<64x64xbf16, #tpu.memory_space<vmem>>, vector<64x64xbf16>
    %cst_37 = arith.constant dense<0.000000e+00> : vector<128x64xf32>
    %66 = tpu.matmul %64, %65, %cst_37 {dimension_numbers = #tpu.dot_dimension_numbers<[1], [0], [0], [1], [0, 0, 1, 1], [], []>} : vector<128x64xbf16>, vector<64x64xbf16>, vector<128x64xf32> -> vector<128x64xf32>
    %c0_38 = arith.constant 0 : index
    %c0_39 = arith.constant 0 : index
    %67 = vector.load %arg12[%c0_38, %c0_39] : memref<1x64xf32, #tpu.memory_space<vmem>>, vector<1x64xf32>
    %68 = vector.broadcast %67 : vector<1x64xf32> to vector<128x64xf32>
    %69 = arith.addf %66, %68 : vector<128x64xf32>
    %cst_40 = arith.constant 0.000000e+00 : f32
    %70 = vector.broadcast %cst_40 : f32 to vector<128x64xf32>
    %71 = arith.maximumf %69, %70 : vector<128x64xf32>
    %cst_41 = arith.constant dense<0.000000e+00> : vector<64xf32>
    %72 = vector.multi_reduction <add>, %71, %cst_41 [0] : vector<128x64xf32> to vector<64xf32>
    %73 = vector.shape_cast %72 : vector<64xf32> to vector<1x64xf32>
    %cst_42 = arith.constant 7.812500e-03 : f32
    %74 = vector.broadcast %cst_42 : f32 to vector<1x64xf32>
    %75 = arith.mulf %73, %74 : vector<1x64xf32>
    %76 = vector.broadcast %75 : vector<1x64xf32> to vector<128x64xf32>
    %77 = arith.subf %71, %76 : vector<128x64xf32>
    %78 = arith.mulf %77, %77 : vector<128x64xf32>
    %cst_43 = arith.constant dense<0.000000e+00> : vector<64xf32>
    %79 = vector.multi_reduction <add>, %78, %cst_43 [0] : vector<128x64xf32> to vector<64xf32>
    %80 = vector.shape_cast %79 : vector<64xf32> to vector<1x64xf32>
    %cst_44 = arith.constant 7.812500e-03 : f32
    %81 = vector.broadcast %cst_44 : f32 to vector<1x64xf32>
    %82 = arith.mulf %80, %81 : vector<1x64xf32>
    %cst_45 = arith.constant 9.99999974E-6 : f32
    %83 = vector.broadcast %cst_45 : f32 to vector<1x64xf32>
    %84 = arith.addf %82, %83 : vector<1x64xf32>
    %85 = math.rsqrt %84 : vector<1x64xf32>
    %c0_46 = arith.constant 0 : index
    %c0_47 = arith.constant 0 : index
    %86 = vector.load %arg13[%c0_46, %c0_47] : memref<1x64xf32, #tpu.memory_space<vmem>>, vector<1x64xf32>
    %87 = arith.mulf %85, %86 : vector<1x64xf32>
    %88 = vector.broadcast %87 : vector<1x64xf32> to vector<128x64xf32>
    %89 = arith.mulf %77, %88 : vector<128x64xf32>
    %c0_48 = arith.constant 0 : index
    %c0_49 = arith.constant 0 : index
    %90 = vector.load %arg14[%c0_48, %c0_49] : memref<1x64xf32, #tpu.memory_space<vmem>>, vector<1x64xf32>
    %91 = vector.broadcast %90 : vector<1x64xf32> to vector<128x64xf32>
    %92 = arith.addf %89, %91 : vector<128x64xf32>
    %93 = arith.truncf %92 : vector<128x64xf32> to vector<128x64xbf16>
    %c0_50 = arith.constant 0 : index
    %c0_51 = arith.constant 0 : index
    %94 = vector.load %arg15[%c0_50, %c0_51] : memref<64x64xbf16, #tpu.memory_space<vmem>>, vector<64x64xbf16>
    %cst_52 = arith.constant dense<0.000000e+00> : vector<128x64xf32>
    %95 = tpu.matmul %93, %94, %cst_52 {dimension_numbers = #tpu.dot_dimension_numbers<[1], [0], [0], [1], [0, 0, 1, 1], [], []>} : vector<128x64xbf16>, vector<64x64xbf16>, vector<128x64xf32> -> vector<128x64xf32>
    %c0_53 = arith.constant 0 : index
    %c0_54 = arith.constant 0 : index
    %96 = vector.load %arg16[%c0_53, %c0_54] : memref<1x64xf32, #tpu.memory_space<vmem>>, vector<1x64xf32>
    %97 = vector.broadcast %96 : vector<1x64xf32> to vector<128x64xf32>
    %98 = arith.addf %95, %97 : vector<128x64xf32>
    %cst_55 = arith.constant 0.000000e+00 : f32
    %99 = vector.broadcast %cst_55 : f32 to vector<128x64xf32>
    %100 = arith.maximumf %98, %99 : vector<128x64xf32>
    %cst_56 = arith.constant dense<0.000000e+00> : vector<64xf32>
    %101 = vector.multi_reduction <add>, %100, %cst_56 [0] : vector<128x64xf32> to vector<64xf32>
    %102 = vector.shape_cast %101 : vector<64xf32> to vector<1x64xf32>
    %cst_57 = arith.constant 7.812500e-03 : f32
    %103 = vector.broadcast %cst_57 : f32 to vector<1x64xf32>
    %104 = arith.mulf %102, %103 : vector<1x64xf32>
    %105 = vector.broadcast %104 : vector<1x64xf32> to vector<128x64xf32>
    %106 = arith.subf %100, %105 : vector<128x64xf32>
    %107 = arith.mulf %106, %106 : vector<128x64xf32>
    %cst_58 = arith.constant dense<0.000000e+00> : vector<64xf32>
    %108 = vector.multi_reduction <add>, %107, %cst_58 [0] : vector<128x64xf32> to vector<64xf32>
    %109 = vector.shape_cast %108 : vector<64xf32> to vector<1x64xf32>
    %cst_59 = arith.constant 7.812500e-03 : f32
    %110 = vector.broadcast %cst_59 : f32 to vector<1x64xf32>
    %111 = arith.mulf %109, %110 : vector<1x64xf32>
    %cst_60 = arith.constant 9.99999974E-6 : f32
    %112 = vector.broadcast %cst_60 : f32 to vector<1x64xf32>
    %113 = arith.addf %111, %112 : vector<1x64xf32>
    %114 = math.rsqrt %113 : vector<1x64xf32>
    %c0_61 = arith.constant 0 : index
    %c0_62 = arith.constant 0 : index
    %115 = vector.load %arg17[%c0_61, %c0_62] : memref<1x64xf32, #tpu.memory_space<vmem>>, vector<1x64xf32>
    %116 = arith.mulf %114, %115 : vector<1x64xf32>
    %117 = vector.broadcast %116 : vector<1x64xf32> to vector<128x64xf32>
    %118 = arith.mulf %106, %117 : vector<128x64xf32>
    %c0_63 = arith.constant 0 : index
    %c0_64 = arith.constant 0 : index
    %119 = vector.load %arg18[%c0_63, %c0_64] : memref<1x64xf32, #tpu.memory_space<vmem>>, vector<1x64xf32>
    %120 = vector.broadcast %119 : vector<1x64xf32> to vector<128x64xf32>
    %121 = arith.addf %118, %120 : vector<128x64xf32>
    %122 = arith.truncf %121 : vector<128x64xf32> to vector<128x64xbf16>
    %c0_65 = arith.constant 0 : index
    %c0_66 = arith.constant 0 : index
    %123 = vector.load %arg19[%c0_65, %c0_66] : memref<64x128xbf16, #tpu.memory_space<vmem>>, vector<64x128xbf16>
    %cst_67 = arith.constant dense<0.000000e+00> : vector<128x128xf32>
    %124 = tpu.matmul %122, %123, %cst_67 {dimension_numbers = #tpu.dot_dimension_numbers<[1], [0], [0], [1], [0, 0, 1, 1], [], []>} : vector<128x64xbf16>, vector<64x128xbf16>, vector<128x128xf32> -> vector<128x128xf32>
    %c0_68 = arith.constant 0 : index
    %c0_69 = arith.constant 0 : index
    %125 = vector.load %arg20[%c0_68, %c0_69] : memref<1x128xf32, #tpu.memory_space<vmem>>, vector<1x128xf32>
    %126 = vector.broadcast %125 : vector<1x128xf32> to vector<128x128xf32>
    %127 = arith.addf %124, %126 : vector<128x128xf32>
    %cst_70 = arith.constant 0.000000e+00 : f32
    %128 = vector.broadcast %cst_70 : f32 to vector<128x128xf32>
    %129 = arith.subf %128, %127 : vector<128x128xf32>
    %130 = math.exp %129 : vector<128x128xf32>
    %cst_71 = arith.constant 1.000000e+00 : f32
    %131 = vector.broadcast %cst_71 : f32 to vector<128x128xf32>
    %132 = arith.addf %131, %130 : vector<128x128xf32>
    %cst_72 = arith.constant 1.000000e+00 : f32
    %133 = vector.broadcast %cst_72 : f32 to vector<128x128xf32>
    %134 = arith.divf %133, %132 : vector<128x128xf32>
    %c0_73 = arith.constant 0 : index
    %c0_74 = arith.constant 0 : index
    %135 = vector.load %arg21[%c0_73, %c0_74] : memref<128x128xf32, #tpu.memory_space<vmem>>, vector<128x128xf32>
    tpu.vector_store %arg21[%c0_73, %c0_74], %134 {strides = array<i32>} : memref<128x128xf32, #tpu.memory_space<vmem>>, vector<128x128xf32>,
    return
  }
}

</mosaic_0001>

<bundles_post_ra>
// kernel: chessnet_forward.1
= control target key start
LH: loop header
LB: loop body
LE: loop exit
PB: predicated region body
PF: predicated region fallthrough
CT: control target
= control target key end

     0   :  { %vm658_vm3 = vcmask 523264   ;;  %s3322_s1 = inlined_call_operand.vmem [shape: bf16[128,128], index: 1, kind: input, shape index: {}]   ;;  %s3323_s2 = inlined_call_operand.vmem [shape: f32[1,128], index: 2, kind: input, shape index: {}]   ;;  %s3324_s0 = inlined_call_operand.vmem [shape: bf16[128,128], index: 0, kind: input, shape index: {}]   ;;  %s3325_s3 = inlined_call_operand.vmem [shape: bf16[128,128], index: 3, kind: input, shape index: {}]   ;;  %s3326_s4 = inlined_call_operand.vmem [shape: f32[1,128], index: 4, kind: input, shape index: {}]   ;;  %s3327_s6 = inlined_call_operand.vmem [shape: f32[1,128], index: 6, kind: input, shape index: {}]   ;;  %s3328_s7 = inlined_call_operand.vmem [shape: bf16[128,64], index: 7, kind: input, shape index: {}]   ;;  %s3329_s5 = inlined_call_operand.vmem [shape: f32[1,128], index: 5, kind: input, shape index: {}]   ;;  %s3330_s8 = inlined_call_operand.vmem [shape: f32[1,64], index: 8, kind: input, shape index: {}]   ;;  %s3331_s11 = inlined_call_operand.vmem [shape: bf16[64,64], index: 11, kind: input, shape index: {}]   ;;  %s3332_s10 = inlined_call_operand.vmem [shape: f32[1,64], index: 10, kind: input, shape index: {}]   ;;  %s3333_s12 = inlined_call_operand.vmem [shape: f32[1,64], index: 12, kind: input, shape index: {}]   ;;  %s3334_s9 = inlined_call_operand.vmem [shape: f32[1,64], index: 9, kind: input, shape index: {}]   ;;  %s3335_s14 = inlined_call_operand.vmem [shape: f32[1,64], index: 14, kind: input, shape index: {}]   ;;  %s3336_s15 = inlined_call_operand.vmem [shape: bf16[64,64], index: 15, kind: input, shape index: {}]   ;;  %s3337_s13 = inlined_call_operand.vmem [shape: f32[1,64], index: 13, kind: input, shape index: {}]   ;;  %s3338_s16 = inlined_call_operand.vmem [shape: f32[1,64], index: 16, kind: input, shape index: {}]   ;;  %s3339_s18 = inlined_call_operand.vmem [shape: f32[1,64], index: 18, kind: input, shape index: {}]   ;;  %s3340_s19 = inlined_call_operand.vmem [shape: bf16[64,128], index: 19, kind: input, shape index: {}]   ;;  %s3341_s17 = inlined_call_operand.vmem [shape: f32[1,64], index: 17, kind: input, shape index: {}]   ;;  %s3342_s20 = inlined_call_operand.vmem [shape: f32[1,128], index: 20, kind: input, shape index: {}]   ;;  %s3343_s21 = inlined_call_operand.vmem [shape: f32[128,128], index: 21, kind: output, shape index: {}]  }
   0x1   :  { %3347 = sst [smem:[#allocation2_spill]] %s3322_s1 }
   0x2   :  { %3348 = sst [smem:[#allocation3_spill]] %s3323_s2 }
   0x3   :  { %3349 = sst [smem:[#allocation4_spill]] %s3324_s0 }
   0x4   :  { %3350 = sst [smem:[#allocation5_spill]] %s3325_s3 }
   0x5   :  { %3351 = sst [smem:[#allocation6_spill]] %s3326_s4 }
   0x6   :  { %3352 = sst [smem:[#allocation7_spill]] %s3327_s6 }
   0x7   :  { %s3353_s26 = sld [smem:[#allocation2_spill]] }
   0x8   :  { %s3354_s28 = sld [smem:[#allocation4_spill]] }
   0x9   :  { %s3356_s23 = sld [smem:[#allocation3_spill]] }
   0xa   :  { %s3357_s2 = sld [smem:[#allocation6_spill]] }
   0xb   :  { %s3358_s3 = sld [smem:[#allocation7_spill]] }
   0xd   :  { %v2055_v0 = vld [vmem:[%s3353_s26 + $0x38] sm:$0xff]  ;;  %v2054_v1 = vld [vmem:[%s3353_s26 + $0x30] sm:$0xff]  ;;  %v2053_v2 = vld [vmem:[%s3353_s26 + $0x28] sm:$0xff] }
   0xe   :  { %201 = vmatpush.bf16.msra.mxu0 %v2055_v0  ;;  %2084 = vmatpush.bf16.msra.mxu1 %v2055_v0  ;;  %v2052_v3 = vld [vmem:[%s3353_s26 + $0x20] sm:$0xff]  ;;  %v2051_v4 = vld [vmem:[%s3353_s26 + $0x18] sm:$0xff]  ;;  %v2050_v5 = vld [vmem:[%s3353_s26 + $0x10] sm:$0xff] }
   0xf   :  { %v2049_v6 = vld [vmem:[%s3353_s26 + $0x8] sm:$0xff]  ;;  %v2048_v7 = vld [vmem:[%s3353_s26] sm:$0xff]  ;;  %s3355_s26 = sld [smem:[#allocation5_spill]]  ;;  %v2042_v15 = vld [vmem:[%s3354_s28 + $0x10] sm:$0xff] }
  0x10   :  { %v2040_v8 = vld [vmem:[%s3354_s28] sm:$0xff]  ;;  %v2041_v9 = vld [vmem:[%s3354_s28 + $0x8] sm:$0xff]  ;;  %v2043_v20 = vld [vmem:[%s3354_s28 + $0x18] sm:$0xff] }
  0x11   :  { %v2044_v10 = vld [vmem:[%s3354_s28 + $0x20] sm:$0xff]  ;;  %v2045_v16 = vld [vmem:[%s3354_s28 + $0x28] sm:$0xff]  ;;  %v2046_v21 = vld [vmem:[%s3354_s28 + $0x30] sm:$0xff] }
  0x12   :  { %202 = vmatpush.bf16.msra.mxu0 %v2054_v1  ;;  %2085 = vmatpush.bf16.msra.mxu1 %v2054_v1  ;;  %v2047_v22 = vld [vmem:[%s3354_s28 + $0x38] sm:$0xff]  ;;  %v2096_v25 = vld [vmem:[%s3356_s23] ss:$0 sm:$0xff] }
  0x15   :  { %v2063_v11 = vld [vmem:[%s3355_s26 + $0x38] sm:$0xff]  ;;  %v2062_v12 = vld [vmem:[%s3355_s26 + $0x30] sm:$0xff]  ;;  %v2061_v13 = vld [vmem:[%s3355_s26 + $0x28] sm:$0xff] }
  0x16   :  { %203 = vmatpush.bf16.msra.mxu0 %v2053_v2  ;;  %2086 = vmatpush.bf16.msra.mxu1 %v2053_v2  ;;  %v2060_v14 = vld [vmem:[%s3355_s26 + $0x20] sm:$0xff]  ;;  %v2059_v17 = vld [vmem:[%s3355_s26 + $0x18] sm:$0xff]  ;;  %v2058_v18 = vld [vmem:[%s3355_s26 + $0x10] sm:$0xff] }
  0x17   :  { %v2057_v19 = vld [vmem:[%s3355_s26 + $0x8] sm:$0xff]  ;;  %v2056_v23 = vld [vmem:[%s3355_s26] sm:$0xff] }
  0x18   :  { %v2097_v2 = vld [vmem:[%s3357_s2] ss:$0 sm:$0xff] }
  0x1a   :  { %204 = vmatpush.bf16.msra.mxu0 %v2052_v3  ;;  %2087 = vmatpush.bf16.msra.mxu1 %v2052_v3 }
  0x1e   :  { %205 = vmatpush.bf16.msra.mxu0 %v2051_v4  ;;  %2088 = vmatpush.bf16.msra.mxu1 %v2051_v4 }
  0x22   :  { %206 = vmatpush.bf16.msra.mxu0 %v2050_v5  ;;  %2089 = vmatpush.bf16.msra.mxu1 %v2050_v5 }
  0x26   :  { %207 = vmatpush.bf16.msra.mxu0 %v2049_v6  ;;  %2090 = vmatpush.bf16.msra.mxu1 %v2049_v6 }
  0x2a   :  { %208 = vmatpush.bf16.msra.mxu0 %v2048_v7  ;;  %2091 = vmatpush.bf16.msra.mxu1 %v2048_v7 }
  0x2d   :  { %209 = vmatmul.bf16.vlgmr.msra.gmra.mxu0 %v2040_v8  ;;  %229 = vmatmul.bf16.vlgmr.msra.gmra.mxu1 %v2044_v10 }
  0x2e   :  { %326 = vmatpush.bf16.msrb.mxu1 %v2063_v11 }
  0x32   :  { %327 = vmatpush.bf16.msrb.mxu1 %v2062_v12 }
  0x36   :  { %328 = vmatpush.bf16.msrb.mxu1 %v2061_v13 }
  0x3a   :  { %329 = vmatpush.bf16.msrb.mxu1 %v2060_v14 }
  0x3d   :  { %214 = vmatmul.bf16.gmra.mxu0 %v2041_v9  ;;  %234 = vmatmul.bf16.gmra.mxu1 %v2045_v16 }
  0x3e   :  { %330 = vmatpush.bf16.msrb.mxu1 %v2059_v17 }
  0x42   :  { %331 = vmatpush.bf16.msrb.mxu1 %v2058_v18 }
  0x46   :  { %332 = vmatpush.bf16.msrb.mxu1 %v2057_v19 }
  0x4a   :  { %333 = vmatpush.bf16.msrb.mxu1 %v2056_v23 }
  0x4d   :  { %219 = vmatmul.bf16.gmra.mxu0 %v2042_v15  ;;  %239 = vmatmul.bf16.gmra.mxu1 %v2046_v21 }
  0x5d   :  { %224 = vmatmul.bf16.gmra.mxu0 %v2043_v20  ;;  %244 = vmatmul.bf16.gmra.mxu1 %v2047_v22 }
  0xaa   :  { %v210_v24 = vpop.f32.mrf.mxu0  ;;  %v230_v40 = vpop.f32.mrf.mxu1 }
  0xab   :  { %v211_v27 = vadd.f32 %v2096_v25, %v210_v24  ;;  %v231_v48 = vadd.f32 %v2096_v25, %v230_v40 }
  0xb2   :  { %v212_v26 = vpop.f32.mrf.mxu0  ;;  %v232_v43 = vpop.f32.mrf.mxu1 }
  0xb3   :  { %v213_v28 = vadd.f32 %v2096_v25, %v212_v26  ;;  %v233_v49 = vadd.f32 %v2096_v25, %v232_v43 }
  0xb5   :  { %v250_v29 = vpack.c.bf16 %v213_v28, %v211_v27  ;;  %v254_v50 = vpack.c.bf16 %v233_v49, %v231_v48 }
  0xb7   :  { %334 = vmatmul.bf16.vlgmr.msrb.gmra.mxu1 %v250_v29 }
  0xba   :  { %v215_v30 = vpop.f32.mrf.mxu0  ;;  %v235_v47 = vpop.f32.mrf.mxu1 }
  0xbb   :  { %v216_v32 = vadd.f32 %v2096_v25, %v215_v30  ;;  %v236_v53 = vadd.f32 %v2096_v25, %v235_v47 }
  0xc2   :  { %v217_v31 = vpop.f32.mrf.mxu0  ;;  %v237_v51 = vpop.f32.mrf.mxu1 }
  0xc3   :  { %v218_v33 = vadd.f32 %v2096_v25, %v217_v31  ;;  %v238_v54 = vadd.f32 %v2096_v25, %v237_v51 }
  0xc5   :  { %v251_v34 = vpack.c.bf16 %v218_v33, %v216_v32  ;;  %v255_v55 = vpack.c.bf16 %v238_v54, %v236_v53 }
  0xc7   :  { %339 = vmatmul.bf16.gmra.mxu1 %v251_v34 }
  0xca   :  { %v220_v35 = vpop.f32.mrf.mxu0  ;;  %v240_v52 = vpop.f32.mrf.mxu1 }
  0xcb   :  { %v221_v37 = vadd.f32 %v2096_v25, %v220_v35  ;;  %v241_v57 = vadd.f32 %v2096_v25, %v240_v52 }
  0xd2   :  { %v222_v36 = vpop.f32.mrf.mxu0  ;;  %v242_v56 = vpop.f32.mrf.mxu1 }
  0xd3   :  { %v223_v38 = vadd.f32 %v2096_v25, %v222_v36  ;;  %v243_v58 = vadd.f32 %v2096_v25, %v242_v56 }
  0xd5   :  { %v252_v39 = vpack.c.bf16 %v223_v38, %v221_v37  ;;  %v256_v60 = vpack.c.bf16 %v243_v58, %v241_v57 }
  0xd7   :  { %344 = vmatmul.bf16.gmra.mxu1 %v252_v39 }
  0xda   :  { %v225_v41 = vpop.f32.mrf.mxu0  ;;  %v245_v59 = vpop.f32.mrf.mxu1 }
  0xdb   :  { %v226_v44 = vadd.f32 %v2096_v25, %v225_v41  ;;  %v246_v62 = vadd.f32 %v2096_v25, %v245_v59 }
  0xe2   :  { %v227_v42 = vpop.f32.mrf.mxu0  ;;  %v247_v61 = vpop.f32.mrf.mxu1 }
  0xe3   :  { %v228_v45 = vadd.f32 %v2096_v25, %v227_v42  ;;  %v248_v63 = vadd.f32 %v2096_v25, %v247_v61 }
  0xe5   :  { %v253_v46 = vpack.c.bf16 %v228_v45, %v226_v44  ;;  %v257_v0 = vpack.c.bf16 %v248_v63, %v246_v62 }
  0xe7   :  { %349 = vmatmul.bf16.gmra.mxu1 %v253_v46 }
  0xf7   :  { %354 = vmatmul.bf16.gmra.mxu1 %v254_v50 }
 0x107   :  { %359 = vmatmul.bf16.gmra.mxu1 %v255_v55 }
 0x117   :  { %364 = vmatmul.bf16.gmra.mxu1 %v256_v60 }
 0x127   :  { %369 = vmatmul.bf16.gmra.mxu1 %v257_v0 }
 0x134   :  { %v335_v1 = vpop.f32.mrf.mxu1 }
 0x135   :  { %v2366_v3 = vadd.f32 %v2097_v2, %v335_v1 }
 0x137   :  { %v375_v6 = vmax.f32 %v2366_v3, 0.0 }
 0x13c   :  { %v337_v4 = vpop.f32.mrf.mxu1 }
 0x13d   :  { %v2368_v5 = vadd.f32 %v2097_v2, %v337_v4 }
 0x13f   :  { %v376_v7 = vmax.f32 %v2368_v5, 0.0 }
 0x141   :  { %v391_v8 = vadd.f32 %v376_v7, %v375_v6 }
 0x144   :  { %v340_v9 = vpop.f32.mrf.mxu1 }
 0x145   :  { %v2376_v10 = vadd.f32 %v2097_v2, %v340_v9 }
 0x147   :  { %v377_v11 = vmax.f32 %v2376_v10, 0.0 }
 0x149   :  { %v392_v12 = vadd.f32 %v391_v8, %v377_v11 }
 0x14c   :  { %v342_v13 = vpop.f32.mrf.mxu1 }
 0x14d   :  { %v2381_v14 = vadd.f32 %v2097_v2, %v342_v13 }
 0x14f   :  { %v378_v15 = vmax.f32 %v2381_v14, 0.0 }
 0x151   :  { %v393_v16 = vadd.f32 %v392_v12, %v378_v15 }
 0x154   :  { %v345_v17 = vpop.f32.mrf.mxu1 }
 0x155   :  { %v346_v18 = vadd.f32 %v2097_v2, %v345_v17 }
 0x157   :  { %v379_v19 = vmax.f32 %v346_v18, 0.0 }
 0x159   :  { %v394_v20 = vadd.f32 %v393_v16, %v379_v19 }
 0x15c   :  { %v347_v21 = vpop.f32.mrf.mxu1 }
 0x15d   :  { %v348_v29 = vadd.f32 %v2097_v2, %v347_v21 }
 0x15f   :  { %v380_v31 = vmax.f32 %v348_v29, 0.0 }
 0x161   :  { %v395_v36 = vadd.f32 %v394_v20, %v380_v31 }
 0x164   :  { %v350_v22 = vpop.f32.mrf.mxu1 }
 0x165   :  { %v351_v30 = vadd.f32 %v2097_v2, %v350_v22 }
 0x167   :  { %v381_v33 = vmax.f32 %v351_v30, 0.0 }
 0x169   :  { %v396_v39 = vadd.f32 %v395_v36, %v381_v33 }
 0x16c   :  { %v352_v23 = vpop.f32.mrf.mxu1 }
 0x16d   :  { %v353_v32 = vadd.f32 %v2097_v2, %v352_v23 }
 0x16f   :  { %v382_v37 = vmax.f32 %v353_v32, 0.0  ;;  %v2071_v32 = vld [vmem:[%s3328_s7 + $0x38] sm:$0xff] }
 0x170   :  { %593 = vmatpush.bf16.msra.mxu2 %v2071_v32 }
 0x171   :  { %v397_v42 = vadd.f32 %v396_v39, %v382_v37  ;;  %v2070_v39 = vld [vmem:[%s3328_s7 + $0x30] sm:$0xff] }
 0x174   :  { %v355_v24 = vpop.f32.mrf.mxu1  ;;  %594 = vmatpush.bf16.msra.mxu2 %v2070_v39 }
 0x175   :  { %v356_v34 = vadd.f32 %v2097_v2, %v355_v24 }
 0x177   :  { %v383_v40 = vmax.f32 %v356_v34, 0.0 }
 0x179   :  { %v398_v45 = vadd.f32 %v397_v42, %v383_v40 }
 0x17c   :  { %v357_v25 = vpop.f32.mrf.mxu1 }
 0x17d   :  { %v358_v38 = vadd.f32 %v2097_v2, %v357_v25 }
 0x17f   :  { %v384_v43 = vmax.f32 %v358_v38, 0.0 }
 0x181   :  { %v399_v49 = vadd.f32 %v398_v45, %v384_v43 }
 0x184   :  { %v360_v26 = vpop.f32.mrf.mxu1 }
 0x185   :  { %v361_v41 = vadd.f32 %v2097_v2, %v360_v26 }
 0x187   :  { %v385_v46 = vmax.f32 %v361_v41, 0.0 }
 0x189   :  { %v400_v52 = vadd.f32 %v399_v49, %v385_v46 }
 0x18c   :  { %v362_v27 = vpop.f32.mrf.mxu1 }
 0x18d   :  { %v363_v44 = vadd.f32 %v2097_v2, %v362_v27 }
 0x18f   :  { %v386_v50 = vmax.f32 %v363_v44, 0.0 }
 0x191   :  { %v401_v55 = vadd.f32 %v400_v52, %v386_v50 }
 0x194   :  { %v365_v28 = vpop.f32.mrf.mxu1 }
 0x195   :  { %v366_v47 = vadd.f32 %v2097_v2, %v365_v28 }
 0x197   :  { %v387_v53 = vmax.f32 %v366_v47, 0.0 }
 0x199   :  { %v402_v57 = vadd.f32 %v401_v55, %v387_v53 }
 0x19c   :  { %v367_v35 = vpop.f32.mrf.mxu1 }
 0x19d   :  { %v368_v51 = vadd.f32 %v2097_v2, %v367_v35 }
 0x19f   :  { %v388_v56 = vmax.f32 %v368_v51, 0.0 }
 0x1a1   :  { %v403_v60 = vadd.f32 %v402_v57, %v388_v56 }
 0x1a4   :  { %v370_v48 = vpop.f32.mrf.mxu1 }
 0x1a5   :  { %v371_v54 = vadd.f32 %v2097_v2, %v370_v48 }
 0x1a7   :  { %v389_v58 = vmax.f32 %v371_v54, 0.0 }
 0x1a9   :  { %v404_v62 = vadd.f32 %v403_v60, %v389_v58 }
 0x1ac   :  { %v372_v59 = vpop.f32.mrf.mxu1 }
 0x1ad   :  { %v373_v61 = vadd.f32 %v2097_v2, %v372_v59 }
 0x1af   :  { %v390_v63 = vmax.f32 %v373_v61, 0.0  ;;  %v2066_v61 = vld [vmem:[%s3328_s7 + $0x10] sm:$0xff] }
 0x1b1   :  { %v405_v0 = vadd.f32 %v404_v62, %v390_v63 }
 0x1b3   :  { %v406_v1 = vrot.slane %v405_v0, 4 }
 0x1b5   :  { %v407_v4 = vadd.f32 %v406_v1, %v405_v0  ;;  %v2065_v0 = vld [vmem:[%s3328_s7 + $0x8] sm:$0xff] }
 0x1b7   :  { %v408_v8 = vrot.slane %v407_v4, 2 }
 0x1b9   :  { %v409_v9 = vadd.f32 %v408_v8, %v407_v4  ;;  %v2064_v4 = vld [vmem:[%s3328_s7] sm:$0xff] }
 0x1bb   :  { %v410_v12 = vrot.slane %v409_v9, 1 }
 0x1bd   :  { %v411_v13 = vadd.f32 %v410_v12, %v409_v9 }
 0x1bf   :  { %v412_v14 = vmul.f32 0.0078125, %v411_v13 }
 0x1c1   :  { %v2386_v16 = vsub.f32 %v375_v6, %v412_v14  ;;  %v2390_v17 = vsub.f32 %v376_v7, %v412_v14  ;;  %v2394_v2 = vsub.f32 %v377_v11, %v412_v14  ;;  %v2396_v18 = vsub.f32 %v378_v15, %v412_v14 }
 0x1c2   :  { %v2398_v20 = vsub.f32 %v379_v19, %v412_v14  ;;  %v2406_v7 = vsub.f32 %v380_v31, %v412_v14  ;;  %v2410_v15 = vsub.f32 %v381_v33, %v412_v14  ;;  %v2414_v23 = vsub.f32 %v382_v37, %v412_v14 }
 0x1c3   :  { %v429_v21 = vmul.f32 %v2386_v16, %v2386_v16  ;;  %v430_v3 = vmul.f32 %v2390_v17, %v2390_v17  ;;  %v431_v6 = vmul.f32 %v2394_v2, %v2394_v2  ;;  %v432_v10 = vmul.f32 %v2396_v18, %v2396_v18 }
 0x1c4   :  { %v433_v19 = vmul.f32 %v2398_v20, %v2398_v20  ;;  %v434_v24 = vmul.f32 %v2406_v7, %v2406_v7  ;;  %v2418_v26 = vsub.f32 %v383_v40, %v412_v14  ;;  %v435_v27 = vmul.f32 %v2410_v15, %v2410_v15 }
 0x1c5   :  { %v445_v5 = vadd.f32 %v430_v3, %v429_v21  ;;  %v2422_v29 = vsub.f32 %v384_v43, %v412_v14  ;;  %v436_v30 = vmul.f32 %v2414_v23, %v2414_v23  ;;  %v2429_v33 = vsub.f32 %v385_v46, %v412_v14  ;;  %v2069_v46 = vld [vmem:[%s3328_s7 + $0x28] sm:$0xff] }
 0x1c6   :  { %v437_v34 = vmul.f32 %v2418_v26, %v2418_v26  ;;  %v2433_v36 = vsub.f32 %v386_v50, %v412_v14  ;;  %v2440_v40 = vsub.f32 %v387_v53, %v412_v14  ;;  %v2444_v43 = vsub.f32 %v388_v56, %v412_v14  ;;  %595 = vmatpush.bf16.msra.mxu2 %v2069_v46  ;;  %v2068_v53 = vld [vmem:[%s3328_s7 + $0x20] sm:$0xff] }
 0x1c7   :  { %v446_v11 = vadd.f32 %v445_v5, %v431_v6  ;;  %v438_v37 = vmul.f32 %v2422_v29, %v2422_v29  ;;  %v439_v41 = vmul.f32 %v2429_v33, %v2429_v33  ;;  %v2451_v47 = vsub.f32 %v389_v58, %v412_v14  ;;  %v2067_v58 = vld [vmem:[%s3328_s7 + $0x18] sm:$0xff] }
 0x1c8   :  { %v440_v44 = vmul.f32 %v2433_v36, %v2433_v36  ;;  %v441_v48 = vmul.f32 %v2440_v40, %v2440_v40  ;;  %v428_v50 = vsub.f32 %v390_v63, %v412_v14  ;;  %v442_v51 = vmul.f32 %v2444_v43, %v2444_v43 }
 0x1c9   :  { %v447_v22 = vadd.f32 %v446_v11, %v432_v10  ;;  %v443_v54 = vmul.f32 %v2451_v47, %v2451_v47  ;;  %v478_v11 = vld [vmem:[%s3329_s5] sm:$0x1] }
 0x1ca   :  { %596 = vmatpush.bf16.msra.mxu2 %v2068_v53  ;;  %v444_v56 = vmul.f32 %v428_v50, %v428_v50 }
 0x1cb   :  { %v448_v25 = vadd.f32 %v447_v22, %v433_v19 }
 0x1cd   :  { %v449_v28 = vadd.f32 %v448_v25, %v434_v24  ;;  %v2098_v25 = vld [vmem:[%s3358_s3] ss:$0 sm:$0xff] }
 0x1ce   :  { %597 = vmatpush.bf16.msra.mxu2 %v2067_v58 }
 0x1cf   :  { %v450_v31 = vadd.f32 %v449_v28, %v435_v27 }
 0x1d1   :  { %v451_v35 = vadd.f32 %v450_v31, %v436_v30 }
 0x1d2   :  { %598 = vmatpush.bf16.msra.mxu2 %v2066_v61 }
 0x1d3   :  { %v452_v38 = vadd.f32 %v451_v35, %v437_v34 }
 0x1d5   :  { %v453_v42 = vadd.f32 %v452_v38, %v438_v37 }
 0x1d6   :  { %599 = vmatpush.bf16.msra.mxu2 %v2065_v0 }
 0x1d7   :  { %v454_v45 = vadd.f32 %v453_v42, %v439_v41 }
 0x1d9   :  { %v455_v49 = vadd.f32 %v454_v45, %v440_v44 }
 0x1da   :  { %600 = vmatpush.bf16.msra.mxu2 %v2064_v4 }
 0x1db   :  { %v456_v52 = vadd.f32 %v455_v49, %v441_v48 }
 0x1dd   :  { %v457_v55 = vadd.f32 %v456_v52, %v442_v51 }
 0x1df   :  { %v458_v57 = vadd.f32 %v457_v55, %v443_v54 }
 0x1e1   :  { %v459_v59 = vadd.f32 %v458_v57, %v444_v56 }
 0x1e3   :  { %v460_v60 = vrot.slane %v459_v59, 4 }
 0x1e5   :  { %v461_v62 = vadd.f32 %v460_v60, %v459_v59 }
 0x1e7   :  { %v462_v63 = vrot.slane %v461_v62, 2 }
 0x1e9   :  { %v463_v1 = vadd.f32 %v462_v63, %v461_v62 }
 0x1eb   :  { %v464_v8 = vrot.slane %v463_v1, 1 }
 0x1ed   :  { %v465_v9 = vadd.f32 %v464_v8, %v463_v1 }
 0x1ef   :  { %v466_v12 = vmul.f32 0.0078125, %v465_v9 }
 0x1f1   :  { %v467_v13 = vadd.f32 1e-05, %v466_v12 }
 0x1f3   :  { %2106 = vrsqrt.f32 %v467_v13  ;;  %vm474_vm1 = vweird.f32 %v467_v13 }
 0x1f9   :  { %v2107_v14 = vpop.eup %2106 }
 0x1fa   :  { %v469_v21 = vmul.f32 %v2107_v14, %v467_v13  ;;  %vm475_vm0 = vweird.f32 %v2107_v14 }
 0x1fb   :  { %vm476_vm2 = vmor %vm474_vm1, %vm475_vm0 }
 0x1fc   :  { %v470_v3 = vmul.f32 %v2107_v14, %v469_v21 }
 0x1fe   :  { %v471_v6 = vmul.f32 0.5, %v470_v3 }
 0x200   :  { %v472_v5 = vsub.f32 1.5, %v471_v6 }
 0x202   :  { %v473_v10 = vmul.f32 %v2107_v14, %v472_v5 }
 0x204   :  { %v477_v19 = vsel %vm476_vm2, %v2107_v14, %v473_v10 }
 0x205   :  { %v479_v22 = vmul.f32 %v478_v11, %v477_v19 }
 0x207   :  { %v480_v24 = vperm.slane %v479_v22, 0 }
 0x209   :  { %v481_v27 = vmul.f32 %v480_v24, %v2386_v16  ;;  %v482_v28 = vmul.f32 %v480_v24, %v2390_v17  ;;  %v496_v32 = vmul.f32 %v480_v24, %v428_v50  ;;  %v489_v35 = vmul.f32 %v480_v24, %v2418_v26 }
 0x20a   :  { %v490_v37 = vmul.f32 %v480_v24, %v2422_v29  ;;  %v491_v38 = vmul.f32 %v480_v24, %v2429_v33  ;;  %v492_v39 = vmul.f32 %v480_v24, %v2433_v36  ;;  %v493_v44 = vmul.f32 %v480_v24, %v2440_v40 }
 0x20b   :  { %v501_v30 = vadd.f32 %v2098_v25, %v481_v27  ;;  %v502_v31 = vadd.f32 %v2098_v25, %v482_v28  ;;  %v509_v41 = vadd.f32 %v2098_v25, %v489_v35  ;;  %v494_v17 = vmul.f32 %v480_v24, %v2444_v43  ;;  %v2075_v35 = vld [vmem:[%s3331_s11 + $0x18] sm:$0xff] }
 0x20c   :  { %v510_v42 = vadd.f32 %v2098_v25, %v490_v37  ;;  %v511_v16 = vadd.f32 %v2098_v25, %v491_v38  ;;  %v512_v45 = vadd.f32 %v2098_v25, %v492_v39  ;;  %v495_v46 = vmul.f32 %v480_v24, %v2451_v47  ;;  %889 = vmatpush.bf16.msrb.mxu2 %v2075_v35 }
 0x20d   :  { %v517_v34 = vpack.c.bf16 %v502_v31, %v501_v30  ;;  %v513_v49 = vadd.f32 %v2098_v25, %v493_v44  ;;  %v516_v26 = vadd.f32 %v2098_v25, %v496_v32  ;;  %v514_v29 = vadd.f32 %v2098_v25, %v494_v17  ;;  %2092 = vmatpush.bf16.msra.mxu3 %v2075_v35 }
 0x20e   :  { %v521_v48 = vpack.c.bf16 %v510_v42, %v509_v41  ;;  %v522_v50 = vpack.c.bf16 %v512_v45, %v511_v16  ;;  %v515_v51 = vadd.f32 %v2098_v25, %v495_v46  ;;  %v483_v36 = vmul.f32 %v480_v24, %v2394_v2 }
 0x20f   :  { %601 = vmatmul.bf16.vlgmr.msra.gmra.mxu2 %v517_v34  ;;  %v523_v33 = vpack.c.bf16 %v514_v29, %v513_v49  ;;  %v484_v53 = vmul.f32 %v480_v24, %v2396_v18  ;;  %v485_v43 = vmul.f32 %v480_v24, %v2398_v20  ;;  %v486_v47 = vmul.f32 %v480_v24, %v2406_v7  ;;  %v2498_v20 = vld [vmem:[%s3330_s8] ss:$0 sm:$0xff] }
 0x210   :  { %v524_v52 = vpack.c.bf16 %v516_v26, %v515_v51  ;;  %v503_v54 = vadd.f32 %v2098_v25, %v483_v36  ;;  %v487_v59 = vmul.f32 %v480_v24, %v2410_v15  ;;  %v488_v60 = vmul.f32 %v480_v24, %v2414_v23 }
 0x211   :  { %v504_v40 = vadd.f32 %v2098_v25, %v484_v53  ;;  %v505_v56 = vadd.f32 %v2098_v25, %v485_v43  ;;  %v506_v57 = vadd.f32 %v2098_v25, %v486_v47 }
 0x212   :  { %v507_v61 = vadd.f32 %v2098_v25, %v487_v59  ;;  %v508_v2 = vadd.f32 %v2098_v25, %v488_v60 }
 0x213   :  { %v518_v55 = vpack.c.bf16 %v504_v40, %v503_v54  ;;  %v519_v58 = vpack.c.bf16 %v506_v57, %v505_v56 }
 0x214   :  { %v520_v62 = vpack.c.bf16 %v508_v2, %v507_v61 }
 0x21f   :  { %606 = vmatmul.bf16.gmra.mxu2 %v518_v55 }
 0x22f   :  { %611 = vmatmul.bf16.gmra.mxu2 %v519_v58 }
 0x23f   :  { %616 = vmatmul.bf16.gmra.mxu2 %v520_v62 }
 0x24f   :  { %621 = vmatmul.bf16.gmra.mxu2 %v521_v48 }
 0x25f   :  { %626 = vmatmul.bf16.gmra.mxu2 %v522_v50 }
 0x26f   :  { %631 = vmatmul.bf16.gmra.mxu2 %v523_v33 }
 0x27f   :  { %636 = vmatmul.bf16.gmra.mxu2 %v524_v52 }
 0x292   :  { %v602_v18 = vpop.f32.mrf.mxu2 }
 0x293   :  { %v2501_v7 = vadd.f32 %v2498_v20, %v602_v18 }
 0x295   :  { %v642_v23 = vmax.f32 %v2501_v7, 0.0 }
 0x297   :  { %v659_v1 = vsel %vm658_vm3, %v642_v23, 0.0 }
 0x29a   :  { %v604_v15 = vpop.f32.mrf.mxu2 }
 0x29b   :  { %v2505_v63 = vadd.f32 %v2498_v20, %v604_v15 }
 0x29d   :  { %v643_v0 = vmax.f32 %v2505_v63, 0.0 }
 0x29f   :  { %v660_v4 = vsel %vm658_vm3, %v643_v0, 0.0 }
 0x2a0   :  { %v661_v8 = vadd.f32 %v660_v4, %v659_v1 }
 0x2a2   :  { %v607_v9 = vpop.f32.mrf.mxu2 }
 0x2a3   :  { %v2515_v12 = vadd.f32 %v2498_v20, %v607_v9 }
 0x2a5   :  { %v644_v13 = vmax.f32 %v2515_v12, 0.0 }
 0x2a7   :  { %v662_v14 = vsel %vm658_vm3, %v644_v13, 0.0 }
 0x2a8   :  { %v663_v21 = vadd.f32 %v662_v14, %v661_v8 }
 0x2aa   :  { %v609_v3 = vpop.f32.mrf.mxu2 }
 0x2ab   :  { %v2522_v6 = vadd.f32 %v2498_v20, %v609_v3 }
 0x2ad   :  { %v645_v5 = vmax.f32 %v2522_v6, 0.0 }
 0x2af   :  { %v664_v10 = vsel %vm658_vm3, %v645_v5, 0.0 }
 0x2b0   :  { %v665_v11 = vadd.f32 %v664_v10, %v663_v21 }
 0x2b2   :  { %v612_v19 = vpop.f32.mrf.mxu2 }
 0x2b3   :  { %v2529_v22 = vadd.f32 %v2498_v20, %v612_v19 }
 0x2b5   :  { %v646_v24 = vmax.f32 %v2529_v22, 0.0 }
 0x2b7   :  { %v666_v25 = vsel %vm658_vm3, %v646_v24, 0.0 }
 0x2b8   :  { %v667_v27 = vadd.f32 %v666_v25, %v665_v11 }
 0x2ba   :  { %v614_v28 = vpop.f32.mrf.mxu2 }
 0x2bb   :  { %v2539_v39 = vadd.f32 %v2498_v20, %v614_v28 }
 0x2bd   :  { %v647_v44 = vmax.f32 %v2539_v39, 0.0 }
 0x2bf   :  { %v668_v46 = vsel %vm658_vm3, %v647_v44, 0.0 }
 0x2c0   :  { %v669_v33 = vadd.f32 %v668_v46, %v667_v27 }
 0x2c2   :  { %v617_v30 = vpop.f32.mrf.mxu2 }
 0x2c3   :  { %v2542_v42 = vadd.f32 %v2498_v20, %v617_v30 }
 0x2c5   :  { %v648_v45 = vmax.f32 %v2542_v42, 0.0 }
 0x2c7   :  { %v670_v50 = vsel %vm658_vm3, %v648_v45, 0.0 }
 0x2c8   :  { %v671_v54 = vadd.f32 %v670_v50, %v669_v33 }
 0x2ca   :  { %v619_v31 = vpop.f32.mrf.mxu2 }
 0x2cb   :  { %v2546_v16 = vadd.f32 %v2498_v20, %v619_v31 }
 0x2cd   :  { %v649_v48 = vmax.f32 %v2546_v16, 0.0 }
 0x2cf   :  { %v672_v52 = vsel %vm658_vm3, %v649_v48, 0.0 }
 0x2d0   :  { %v673_v47 = vadd.f32 %v672_v52, %v671_v54 }
 0x2d2   :  { %v622_v32 = vpop.f32.mrf.mxu2 }
 0x2d3   :  { %v2550_v17 = vadd.f32 %v2498_v20, %v622_v32 }
 0x2d5   :  { %v650_v29 = vmax.f32 %v2550_v17, 0.0 }
 0x2d7   :  { %v674_v40 = vsel %vm658_vm3, %v650_v29, 0.0 }
 0x2d8   :  { %v675_v59 = vadd.f32 %v674_v40, %v673_v47 }
 0x2da   :  { %v624_v34 = vpop.f32.mrf.mxu2 }
 0x2db   :  { %v2555_v49 = vadd.f32 %v2498_v20, %v624_v34 }
 0x2dd   :  { %v651_v36 = vmax.f32 %v2555_v49, 0.0 }
 0x2df   :  { %v676_v56 = vsel %vm658_vm3, %v651_v36, 0.0 }
 0x2e0   :  { %v677_v18 = vadd.f32 %v676_v56, %v675_v59 }
 0x2e2   :  { %v627_v37 = vpop.f32.mrf.mxu2 }
 0x2e3   :  { %v2562_v51 = vadd.f32 %v2498_v20, %v627_v37 }
 0x2e5   :  { %v652_v55 = vmax.f32 %v2562_v51, 0.0 }
 0x2e7   :  { %v678_v61 = vsel %vm658_vm3, %v652_v55, 0.0 }
 0x2e8   :  { %v679_v4 = vadd.f32 %v678_v61, %v677_v18 }
 0x2ea   :  { %v629_v38 = vpop.f32.mrf.mxu2 }
 0x2eb   :  { %v2569_v53 = vadd.f32 %v2498_v20, %v629_v38 }
 0x2ed   :  { %v653_v57 = vmax.f32 %v2569_v53, 0.0 }
 0x2ef   :  { %v680_v15 = vsel %vm658_vm3, %v653_v57, 0.0 }
 0x2f0   :  { %v681_v14 = vadd.f32 %v680_v15, %v679_v4 }
 0x2f2   :  { %v632_v41 = vpop.f32.mrf.mxu2 }
 0x2f3   :  { %v2576_v43 = vadd.f32 %v2498_v20, %v632_v41 }
 0x2f5   :  { %v654_v2 = vmax.f32 %v2576_v43, 0.0 }
 0x2f7   :  { %v682_v8 = vsel %vm658_vm3, %v654_v2, 0.0 }
 0x2f8   :  { %v683_v3 = vadd.f32 %v682_v8, %v681_v14 }
 0x2fa   :  { %v634_v26 = vpop.f32.mrf.mxu2 }
 0x2fb   :  { %v2583_v58 = vadd.f32 %v2498_v20, %v634_v26 }
 0x2fd   :  { %v655_v1 = vmax.f32 %v2583_v58, 0.0 }
 0x2ff   :  { %v684_v21 = vsel %vm658_vm3, %v655_v1, 0.0 }
 0x300   :  { %v685_v25 = vadd.f32 %v684_v21, %v683_v3 }
 0x302   :  { %v637_v60 = vpop.f32.mrf.mxu2 }
 0x303   :  { %v2590_v62 = vadd.f32 %v2498_v20, %v637_v60 }
 0x305   :  { %v656_v9 = vmax.f32 %v2590_v62, 0.0 }
 0x307   :  { %v686_v11 = vsel %vm658_vm3, %v656_v9, 0.0 }
 0x308   :  { %v687_v28 = vadd.f32 %v686_v11, %v685_v25 }
 0x30a   :  { %v639_v10 = vpop.f32.mrf.mxu2 }
 0x30b   :  { %v2607_v19 = vadd.f32 %v2498_v20, %v639_v10 }
 0x30d   :  { %v657_v27 = vmax.f32 %v2607_v19, 0.0 }
 0x30f   :  { %v688_v30 = vsel %vm658_vm3, %v657_v27, 0.0 }
 0x310   :  { %v689_v31 = vadd.f32 %v688_v30, %v687_v28 }
 0x312   :  { %v690_v32 = vrot.slane %v689_v31, 4 }
 0x314   :  { %v691_v34 = vadd.f32 %v690_v32, %v689_v31 }
 0x316   :  { %v692_v35 = vrot.slane %v691_v34, 2 }
 0x318   :  { %v693_v37 = vadd.f32 %v692_v35, %v691_v34 }
 0x31a   :  { %v694_v38 = vrot.slane %v693_v37, 1 }
 0x31c   :  { %v695_v39 = vadd.f32 %v694_v38, %v693_v37 }
 0x31e   :  { %v696_v41 = vmul.f32 0.0078125, %v695_v39 }
 0x320   :  { %v2613_v46 = vsub.f32 %v642_v23, %v696_v41  ;;  %v2617_v20 = vsub.f32 %v643_v0, %v696_v41  ;;  %v2621_v26 = vsub.f32 %v644_v13, %v696_v41  ;;  %v2625_v50 = vsub.f32 %v645_v5, %v696_v41 }
 0x321   :  { %v2629_v33 = vsub.f32 %v646_v24, %v696_v41  ;;  %v2637_v0 = vsub.f32 %v647_v44, %v696_v41  ;;  %v2645_v22 = vsub.f32 %v648_v45, %v696_v41  ;;  %v2652_v44 = vsub.f32 %v649_v48, %v696_v41 }
 0x322   :  { %v713_v7 = vmul.f32 %v2613_v46, %v2613_v46  ;;  %v714_v23 = vmul.f32 %v2617_v20, %v2617_v20  ;;  %v715_v63 = vmul.f32 %v2621_v26, %v2621_v26  ;;  %v716_v12 = vmul.f32 %v2625_v50, %v2625_v50 }
 0x323   :  { %v717_v24 = vmul.f32 %v2629_v33, %v2629_v33  ;;  %v718_v40 = vmul.f32 %v2637_v0, %v2637_v0  ;;  %v2659_v42 = vsub.f32 %v650_v29, %v696_v41  ;;  %v719_v45 = vmul.f32 %v2645_v22, %v2645_v22 }
 0x324   :  { %v729_v13 = vsel %vm658_vm3, %v713_v7, 0.0  ;;  %v730_v6 = vsel %vm658_vm3, %v714_v23, 0.0  ;;  %v732_v52 = vsel %vm658_vm3, %v715_v63, 0.0  ;;  %v734_v47 = vsel %vm658_vm3, %v716_v12, 0.0  ;;  %v2074_v23 = vld [vmem:[%s3331_s11 + $0x10] sm:$0xff] }
 0x325   :  { %v731_v5 = vadd.f32 %v730_v6, %v729_v13  ;;  %v736_v59 = vsel %vm658_vm3, %v717_v24, 0.0  ;;  %v2666_v16 = vsub.f32 %v651_v36, %v696_v41  ;;  %v720_v48 = vmul.f32 %v2652_v44, %v2652_v44  ;;  %890 = vmatpush.bf16.msrb.mxu2 %v2074_v23  ;;  %2093 = vmatpush.bf16.msra.mxu3 %v2074_v23  ;;  %v2073_v13 = vld [vmem:[%s3331_s11 + $0x8] sm:$0xff] }
 0x326   :  { %v738_v61 = vsel %vm658_vm3, %v718_v40, 0.0  ;;  %v2673_v17 = vsub.f32 %v652_v55, %v696_v41  ;;  %v721_v29 = vmul.f32 %v2659_v42, %v2659_v42  ;;  %v740_v15 = vsel %vm658_vm3, %v719_v45, 0.0 }
 0x327   :  { %v733_v54 = vadd.f32 %v732_v52, %v731_v5  ;;  %v2680_v49 = vsub.f32 %v653_v57, %v696_v41  ;;  %v722_v36 = vmul.f32 %v2666_v16, %v2666_v16  ;;  %v742_v8 = vsel %vm658_vm3, %v720_v48, 0.0  ;;  %v2072_v5 = vld [vmem:[%s3331_s11] sm:$0xff] }
 0x328   :  { %v2687_v51 = vsub.f32 %v654_v2, %v696_v41  ;;  %v723_v55 = vmul.f32 %v2673_v17, %v2673_v17  ;;  %v744_v21 = vsel %vm658_vm3, %v721_v29, 0.0  ;;  %v2694_v53 = vsub.f32 %v655_v1, %v696_v41  ;;  %v778_v48 = vld [vmem:[%s3334_s9] sm:$0x1] }
 0x329   :  { %v735_v56 = vadd.f32 %v734_v47, %v733_v54  ;;  %v724_v57 = vmul.f32 %v2680_v49, %v2680_v49  ;;  %v746_v10 = vsel %vm658_vm3, %v722_v36, 0.0  ;;  %v2701_v43 = vsub.f32 %v656_v9, %v696_v41  ;;  %891 = vmatpush.bf16.msrb.mxu2 %v2073_v13  ;;  %2094 = vmatpush.bf16.msra.mxu3 %v2073_v13 }
 0x32a   :  { %v725_v2 = vmul.f32 %v2687_v51, %v2687_v51  ;;  %v748_v19 = vsel %vm658_vm3, %v723_v55, 0.0  ;;  %v712_v28 = vsub.f32 %v657_v27, %v696_v41  ;;  %v726_v58 = vmul.f32 %v2694_v53, %v2694_v53 }
 0x32b   :  { %v737_v60 = vadd.f32 %v736_v59, %v735_v56  ;;  %v750_v1 = vsel %vm658_vm3, %v724_v57, 0.0  ;;  %v727_v31 = vmul.f32 %v2701_v43, %v2701_v43 }
 0x32c   :  { %v752_v62 = vsel %vm658_vm3, %v725_v2, 0.0  ;;  %v728_v32 = vmul.f32 %v712_v28, %v712_v28  ;;  %v754_v34 = vsel %vm658_vm3, %v726_v58, 0.0 }
 0x32d   :  { %v739_v18 = vadd.f32 %v738_v61, %v737_v60  ;;  %v756_v37 = vsel %vm658_vm3, %v727_v31, 0.0  ;;  %892 = vmatpush.bf16.msrb.mxu2 %v2072_v5  ;;  %2095 = vmatpush.bf16.msra.mxu3 %v2072_v5 }
 0x32e   :  { %v758_v27 = vsel %vm658_vm3, %v728_v32, 0.0 }
 0x32f   :  { %v741_v4 = vadd.f32 %v740_v15, %v739_v18  ;;  %v2100_v15 = vld [vmem:[%s3332_s10] ss:$0 sm:$0xff] }
 0x331   :  { %v743_v14 = vadd.f32 %v742_v8, %v741_v4 }
 0x333   :  { %v745_v3 = vadd.f32 %v744_v21, %v743_v14 }
 0x335   :  { %v747_v11 = vadd.f32 %v746_v10, %v745_v3 }
 0x337   :  { %v749_v25 = vadd.f32 %v748_v19, %v747_v11 }
 0x339   :  { %v751_v30 = vadd.f32 %v750_v1, %v749_v25 }
 0x33b   :  { %v753_v9 = vadd.f32 %v752_v62, %v751_v30 }
 0x33d   :  { %v755_v35 = vadd.f32 %v754_v34, %v753_v9 }
 0x33f   :  { %v757_v38 = vadd.f32 %v756_v37, %v755_v35 }
 0x341   :  { %v759_v39 = vadd.f32 %v758_v27, %v757_v38 }
 0x343   :  { %v760_v41 = vrot.slane %v759_v39, 4 }
 0x345   :  { %v761_v7 = vadd.f32 %v760_v41, %v759_v39 }
 0x347   :  { %v762_v63 = vrot.slane %v761_v7, 2 }
 0x349   :  { %v763_v12 = vadd.f32 %v762_v63, %v761_v7 }
 0x34b   :  { %v764_v6 = vrot.slane %v763_v12, 1 }
 0x34d   :  { %v765_v24 = vadd.f32 %v764_v6, %v763_v12 }
 0x34f   :  { %v766_v52 = vmul.f32 0.0078125, %v765_v24 }
 0x351   :  { %v767_v54 = vadd.f32 1e-05, %v766_v52 }
 0x353   :  { %2108 = vrsqrt.f32 %v767_v54  ;;  %vm774_vm5 = vweird.f32 %v767_v54 }
 0x359   :  { %v2109_v40 = vpop.eup %2108 }
 0x35a   :  { %v769_v47 = vmul.f32 %v2109_v40, %v767_v54  ;;  %vm775_vm4 = vweird.f32 %v2109_v40 }
 0x35b   :  { %vm776_vm6 = vmor %vm774_vm5, %vm775_vm4 }
 0x35c   :  { %v770_v56 = vmul.f32 %v2109_v40, %v769_v47 }
 0x35e   :  { %v771_v45 = vmul.f32 0.5, %v770_v56 }
 0x360   :  { %v772_v59 = vsub.f32 1.5, %v771_v45 }
 0x362   :  { %v773_v60 = vmul.f32 %v2109_v40, %v772_v59 }
 0x364   :  { %v777_v61 = vsel %vm776_vm6, %v2109_v40, %v773_v60 }
 0x365   :  { %v779_v18 = vmul.f32 %v778_v48, %v777_v61 }
 0x367   :  { %v780_v29 = vperm.slane %v779_v18, 0 }
 0x369   :  { %v781_v4 = vmul.f32 %v780_v29, %v2613_v46  ;;  %v782_v36 = vmul.f32 %v780_v29, %v2617_v20  ;;  %v787_v8 = vmul.f32 %v780_v29, %v2645_v22  ;;  %v788_v14 = vmul.f32 %v780_v29, %v2652_v44 }
 0x36a   :  { %v796_v10 = vmul.f32 %v780_v29, %v712_v28  ;;  %v795_v19 = vmul.f32 %v780_v29, %v2701_v43  ;;  %v783_v22 = vmul.f32 %v780_v29, %v2621_v26  ;;  %v784_v44 = vmul.f32 %v780_v29, %v2625_v50 }
 0x36b   :  { %v801_v55 = vadd.f32 %v2100_v15, %v781_v4  ;;  %v802_v21 = vadd.f32 %v2100_v15, %v782_v36  ;;  %v807_v3 = vadd.f32 %v2100_v15, %v787_v8  ;;  %v808_v57 = vadd.f32 %v2100_v15, %v788_v14 }
 0x36c   :  { %v816_v46 = vadd.f32 %v2100_v15, %v796_v10  ;;  %v815_v25 = vadd.f32 %v2100_v15, %v795_v19  ;;  %v789_v58 = vmul.f32 %v780_v29, %v2659_v42  ;;  %v790_v1 = vmul.f32 %v780_v29, %v2666_v16 }
 0x36d   :  { %v817_v11 = vpack.c.bf16 %v802_v21, %v801_v55  ;;  %v820_v2 = vpack.c.bf16 %v808_v57, %v807_v3  ;;  %v803_v28 = vadd.f32 %v2100_v15, %v783_v22  ;;  %v804_v30 = vadd.f32 %v2100_v15, %v784_v44 }
 0x36e   :  { %v824_v20 = vpack.c.bf16 %v816_v46, %v815_v25  ;;  %v809_v31 = vadd.f32 %v2100_v15, %v789_v58  ;;  %v810_v62 = vadd.f32 %v2100_v15, %v790_v1  ;;  %v785_v43 = vmul.f32 %v780_v29, %v2629_v33 }
 0x36f   :  { %1984 = vmatmul.msk.bf16.vlgmr.msrb.gmra.mxu2 %vm658_vm3, %v817_v11  ;;  %1987 = vmatmul.msk.bf16.vlgmr.msra.gmra.mxu3 %vm658_vm3, %v820_v2  ;;  %v818_v9 = vpack.c.bf16 %v804_v30, %v803_v28  ;;  %v786_v26 = vmul.f32 %v780_v29, %v2637_v0  ;;  %v791_v50 = vmul.f32 %v780_v29, %v2673_v17 }
 0x370   :  { %v821_v32 = vpack.c.bf16 %v810_v62, %v809_v31  ;;  %v792_v42 = vmul.f32 %v780_v29, %v2680_v49  ;;  %v805_v34 = vadd.f32 %v2100_v15, %v785_v43  ;;  %v793_v39 = vmul.f32 %v780_v29, %v2687_v51  ;;  %v2756_v51 = vld [vmem:[%s3333_s12] ss:$0 sm:$0xff] }
 0x371   :  { %v806_v16 = vadd.f32 %v2100_v15, %v786_v26  ;;  %v811_v35 = vadd.f32 %v2100_v15, %v791_v50  ;;  %v794_v33 = vmul.f32 %v780_v29, %v2694_v53 }
 0x372   :  { %v812_v37 = vadd.f32 %v2100_v15, %v792_v42  ;;  %v813_v41 = vadd.f32 %v2100_v15, %v793_v39 }
 0x373   :  { %v819_v38 = vpack.c.bf16 %v806_v16, %v805_v34  ;;  %v814_v0 = vadd.f32 %v2100_v15, %v794_v33 }
 0x374   :  { %v822_v27 = vpack.c.bf16 %v812_v37, %v811_v35 }
 0x375   :  { %v823_v7 = vpack.c.bf16 %v814_v0, %v813_v41 }
 0x37f   :  { %1985 = vmatmul.msk.bf16.gmra.mxu2 %vm658_vm3, %v818_v9  ;;  %1988 = vmatmul.msk.bf16.gmra.mxu3 %vm658_vm3, %v821_v32 }
 0x38f   :  { %1986 = vmatmul.msk.bf16.gmra.mxu2 %vm658_vm3, %v819_v38  ;;  %1989 = vmatmul.msk.bf16.gmra.mxu3 %vm658_vm3, %v822_v27 }
 0x39f   :  { %1990 = vmatmul.msk.bf16.gmra.mxu3 %vm658_vm3, %v823_v7 }
 0x3af   :  { %1991 = vmatmul.msk.bf16.gmra.mxu3 %vm658_vm3, %v824_v20 }
 0x3f2   :  { %v894_v17 = vpop.f32.mrf.mxu2  ;;  %v909_v49 = vpop.f32.mrf.mxu3 }
 0x3f3   :  { %v2762_v24 = vadd.f32 %v2756_v51, %v894_v17  ;;  %v2788_v36 = vadd.f32 %v2756_v51, %v909_v49 }
 0x3f5   :  { %v934_v56 = vmax.f32 %v2762_v24, 0.0  ;;  %v940_v2 = vmax.f32 %v2788_v36, 0.0 }
 0x3f7   :  { %v950_v18 = vsel %vm658_vm3, %v934_v56, 0.0  ;;  %v961_v58 = vsel %vm658_vm3, %v940_v2, 0.0 }
 0x3fa   :  { %v896_v23 = vpop.f32.mrf.mxu2  ;;  %v911_v63 = vpop.f32.mrf.mxu3 }
 0x3fb   :  { %v2759_v5 = vadd.f32 %v2756_v51, %v896_v23  ;;  %v2800_v10 = vadd.f32 %v2756_v51, %v911_v63 }
 0x3fd   :  { %v935_v54 = vmax.f32 %v2759_v5, 0.0  ;;  %v941_v20 = vmax.f32 %v2800_v10, 0.0 }
 0x3ff   :  { %v951_v48 = vsel %vm658_vm3, %v935_v54, 0.0  ;;  %v963_v30 = vsel %vm658_vm3, %v941_v20, 0.0 }
 0x400   :  { %v952_v4 = vadd.f32 %v951_v48, %v950_v18 }
 0x402   :  { %v899_v12 = vpop.f32.mrf.mxu2  ;;  %v914_v13 = vpop.f32.mrf.mxu3 }
 0x403   :  { %v2765_v52 = vadd.f32 %v2756_v51, %v899_v12  ;;  %v2807_v22 = vadd.f32 %v2756_v51, %v914_v13 }
 0x405   :  { %v936_v45 = vmax.f32 %v2765_v52, 0.0  ;;  %v942_v31 = vmax.f32 %v2807_v22, 0.0 }
 0x407   :  { %v953_v29 = vsel %vm658_vm3, %v936_v45, 0.0  ;;  %v965_v32 = vsel %vm658_vm3, %v942_v31, 0.0 }
 0x408   :  { %v954_v14 = vadd.f32 %v953_v29, %v952_v4 }
 0x40a   :  { %v901_v6 = vpop.f32.mrf.mxu2  ;;  %v916_v53 = vpop.f32.mrf.mxu3 }
 0x40b   :  { %v2769_v40 = vadd.f32 %v2756_v51, %v901_v6  ;;  %v2817_v62 = vadd.f32 %v2756_v51, %v916_v53 }
 0x40d   :  { %v937_v61 = vmax.f32 %v2769_v40, 0.0  ;;  %v943_v43 = vmax.f32 %v2817_v62, 0.0 }
 0x40f   :  { %v955_v8 = vsel %vm658_vm3, %v937_v61, 0.0  ;;  %v967_v34 = vsel %vm658_vm3, %v943_v43, 0.0 }
 0x410   :  { %v956_v11 = vadd.f32 %v955_v8, %v954_v14 }
 0x412   :  { %v904_v47 = vpop.f32.mrf.mxu2  ;;  %v919_v60 = vpop.f32.mrf.mxu3 }
 0x413   :  { %v2774_v59 = vadd.f32 %v2756_v51, %v904_v47  ;;  %v2824_v26 = vadd.f32 %v2756_v51, %v919_v60 }
 0x415   :  { %v938_v15 = vmax.f32 %v2774_v59, 0.0  ;;  %v944_v16 = vmax.f32 %v2824_v26, 0.0 }
 0x417   :  { %v957_v21 = vsel %vm658_vm3, %v938_v15, 0.0  ;;  %v969_v38 = vsel %vm658_vm3, %v944_v16, 0.0 }
 0x418   :  { %v958_v46 = vadd.f32 %v957_v21, %v956_v11 }
 0x41a   :  { %v906_v55 = vpop.f32.mrf.mxu2  ;;  %v921_v57 = vpop.f32.mrf.mxu3 }
 0x41b   :  { %v2797_v3 = vadd.f32 %v2756_v51, %v906_v55  ;;  %v2831_v35 = vadd.f32 %v2756_v51, %v921_v57 }
 0x41d   :  { %v939_v19 = vmax.f32 %v2797_v3, 0.0  ;;  %v945_v27 = vmax.f32 %v2831_v35, 0.0 }
 0x41f   :  { %v959_v25 = vsel %vm658_vm3, %v939_v19, 0.0  ;;  %v971_v7 = vsel %vm658_vm3, %v945_v27, 0.0 }
 0x420   :  { %v960_v44 = vadd.f32 %v959_v25, %v958_v46 }
 0x422   :  { %v962_v1 = vadd.f32 %v961_v58, %v960_v44  ;;  %v924_v28 = vpop.f32.mrf.mxu3 }
 0x423   :  { %v2836_v39 = vadd.f32 %v2756_v51, %v924_v28 }
 0x424   :  { %v964_v9 = vadd.f32 %v963_v30, %v962_v1 }
 0x425   :  { %v946_v17 = vmax.f32 %v2836_v39, 0.0 }
 0x426   :  { %v966_v50 = vadd.f32 %v965_v32, %v964_v9 }
 0x427   :  { %v973_v12 = vsel %vm658_vm3, %v946_v17, 0.0 }
 0x428   :  { %v968_v37 = vadd.f32 %v967_v34, %v966_v50 }
 0x42a   :  { %v926_v42 = vpop.f32.mrf.mxu3  ;;  %v970_v33 = vadd.f32 %v969_v38, %v968_v37 }
 0x42b   :  { %v2839_v41 = vadd.f32 %v2756_v51, %v926_v42 }
 0x42c   :  { %v972_v23 = vadd.f32 %v971_v7, %v970_v33 }
 0x42d   :  { %v947_v63 = vmax.f32 %v2839_v41, 0.0 }
 0x42e   :  { %v974_v6 = vadd.f32 %v973_v12, %v972_v23 }
 0x42f   :  { %v975_v53 = vsel %vm658_vm3, %v947_v63, 0.0 }
 0x430   :  { %v976_v18 = vadd.f32 %v975_v53, %v974_v6 }
 0x432   :  { %v929_v0 = vpop.f32.mrf.mxu3 }
 0x433   :  { %v2844_v49 = vadd.f32 %v2756_v51, %v929_v0 }
 0x435   :  { %v948_v13 = vmax.f32 %v2844_v49, 0.0 }
 0x437   :  { %v977_v60 = vsel %vm658_vm3, %v948_v13, 0.0 }
 0x438   :  { %v978_v4 = vadd.f32 %v977_v60, %v976_v18 }
 0x43a   :  { %v931_v47 = vpop.f32.mrf.mxu3 }
 0x43b   :  { %v2854_v48 = vadd.f32 %v2756_v51, %v931_v47 }
 0x43d   :  { %v949_v29 = vmax.f32 %v2854_v48, 0.0 }
 0x43f   :  { %v979_v8 = vsel %vm658_vm3, %v949_v29, 0.0 }
 0x440   :  { %v980_v14 = vadd.f32 %v979_v8, %v978_v4 }
 0x442   :  { %v981_v55 = vrot.slane %v980_v14, 4 }
 0x444   :  { %v982_v21 = vadd.f32 %v981_v55, %v980_v14 }
 0x446   :  { %v983_v3 = vrot.slane %v982_v21, 2 }
 0x448   :  { %v984_v57 = vadd.f32 %v983_v3, %v982_v21 }
 0x44a   :  { %v985_v11 = vrot.slane %v984_v57, 1 }
 0x44c   :  { %v986_v46 = vadd.f32 %v985_v11, %v984_v57 }
 0x44e   :  { %v987_v25 = vmul.f32 0.0078125, %v986_v46 }
 0x450   :  { %v2860_v44 = vsub.f32 %v934_v56, %v987_v25  ;;  %v2864_v51 = vsub.f32 %v935_v54, %v987_v25  ;;  %v2868_v58 = vsub.f32 %v936_v45, %v987_v25  ;;  %v2872_v1 = vsub.f32 %v937_v61, %v987_v25 }
 0x451   :  { %v2880_v56 = vsub.f32 %v938_v15, %v987_v25  ;;  %v2884_v52 = vsub.f32 %v939_v19, %v987_v25  ;;  %v2892_v30 = vsub.f32 %v940_v2, %v987_v25  ;;  %v2899_v19 = vsub.f32 %v941_v20, %v987_v25 }
 0x452   :  { %v1004_v28 = vmul.f32 %v2860_v44, %v2860_v44  ;;  %v1005_v24 = vmul.f32 %v2864_v51, %v2864_v51  ;;  %v1006_v5 = vmul.f32 %v2868_v58, %v2868_v58  ;;  %v1007_v54 = vmul.f32 %v2872_v1, %v2872_v1 }
 0x453   :  { %v1008_v59 = vmul.f32 %v2880_v56, %v2880_v56  ;;  %v1009_v32 = vmul.f32 %v2884_v52, %v2884_v52  ;;  %v2906_v36 = vsub.f32 %v942_v31, %v987_v25  ;;  %v1010_v2 = vmul.f32 %v2892_v30, %v2892_v30 }
 0x454   :  { %v1020_v40 = vsel %vm658_vm3, %v1004_v28, 0.0  ;;  %v1021_v45 = vsel %vm658_vm3, %v1005_v24, 0.0  ;;  %v1023_v15 = vsel %vm658_vm3, %v1006_v5, 0.0  ;;  %v1025_v26 = vsel %vm658_vm3, %v1007_v54, 0.0  ;;  %v2078_v5 = vld [vmem:[%s3336_s15 + $0x10] sm:$0xff] }
 0x455   :  { %v1022_v61 = vadd.f32 %v1021_v45, %v1020_v40  ;;  %v1027_v42 = vsel %vm658_vm3, %v1008_v59, 0.0  ;;  %v2913_v10 = vsub.f32 %v943_v43, %v987_v25  ;;  %v1011_v20 = vmul.f32 %v2899_v19, %v2899_v19  ;;  %v2077_v45 = vld [vmem:[%s3336_s15 + $0x8] sm:$0xff]  ;;  %v2076_v59 = vld [vmem:[%s3336_s15] sm:$0xff] }
 0x456   :  { %v1029_v35 = vsel %vm658_vm3, %v1009_v32, 0.0  ;;  %v2918_v38 = vsub.f32 %v944_v16, %v987_v25  ;;  %v1012_v22 = vmul.f32 %v2906_v36, %v2906_v36  ;;  %v1031_v31 = vsel %vm658_vm3, %v1010_v2, 0.0 }
 0x457   :  { %v1024_v9 = vadd.f32 %v1023_v15, %v1022_v61  ;;  %v2923_v33 = vsub.f32 %v945_v27, %v987_v25  ;;  %v1013_v62 = vmul.f32 %v2913_v10, %v2913_v10  ;;  %v1033_v43 = vsel %vm658_vm3, %v1011_v20, 0.0 }
 0x458   :  { %v2928_v0 = vsub.f32 %v946_v17, %v987_v25  ;;  %v1014_v16 = vmul.f32 %v2918_v38, %v2918_v38  ;;  %v1035_v7 = vsel %vm658_vm3, %v1012_v22, 0.0  ;;  %v2933_v12 = vsub.f32 %v947_v63, %v987_v25 }
 0x459   :  { %v1026_v50 = vadd.f32 %v1025_v26, %v1024_v9  ;;  %v1015_v27 = vmul.f32 %v2923_v33, %v2923_v33  ;;  %v1037_v6 = vsel %vm658_vm3, %v1013_v62, 0.0  ;;  %v2940_v47 = vsub.f32 %v948_v13, %v987_v25 }
 0x45a   :  { %v1016_v17 = vmul.f32 %v2928_v0, %v2928_v0  ;;  %v1039_v60 = vsel %vm658_vm3, %v1014_v16, 0.0  ;;  %v1003_v18 = vsub.f32 %v949_v29, %v987_v25  ;;  %v1017_v63 = vmul.f32 %v2933_v12, %v2933_v12  ;;  %v2079_v25 = vld [vmem:[%s3336_s15 + $0x18] sm:$0xff] }
 0x45b   :  { %v1028_v34 = vadd.f32 %v1027_v42, %v1026_v50  ;;  %v1041_v4 = vsel %vm658_vm3, %v1015_v27, 0.0  ;;  %v1018_v14 = vmul.f32 %v2940_v47, %v2940_v47  ;;  %1180 = vmatpush.bf16.msrb.mxu3 %v2079_v25 }
 0x45c   :  { %v1043_v49 = vsel %vm658_vm3, %v1016_v17, 0.0  ;;  %v1019_v55 = vmul.f32 %v1003_v18, %v1003_v18  ;;  %v1045_v21 = vsel %vm658_vm3, %v1017_v63, 0.0 }
 0x45d   :  { %v1030_v37 = vadd.f32 %v1029_v35, %v1028_v34  ;;  %v1047_v57 = vsel %vm658_vm3, %v1018_v14, 0.0  ;;  %v1069_v35 = vld [vmem:[%s3337_s13] sm:$0x1] }
 0x45e   :  { %v1049_v29 = vsel %vm658_vm3, %v1019_v55, 0.0 }
 0x45f   :  { %v1032_v39 = vadd.f32 %v1031_v31, %v1030_v37  ;;  %1181 = vmatpush.bf16.msrb.mxu3 %v2078_v5 }
 0x461   :  { %v1034_v41 = vadd.f32 %v1033_v43, %v1032_v39  ;;  %v2102_v39 = vld [vmem:[%s3335_s14] ss:$0 sm:$0xff] }
 0x463   :  { %v1036_v23 = vadd.f32 %v1035_v7, %v1034_v41  ;;  %1182 = vmatpush.bf16.msrb.mxu3 %v2077_v45 }
 0x465   :  { %v1038_v53 = vadd.f32 %v1037_v6, %v1036_v23 }
 0x467   :  { %v1040_v48 = vadd.f32 %v1039_v60, %v1038_v53  ;;  %1183 = vmatpush.bf16.msrb.mxu3 %v2076_v59 }
 0x469   :  { %v1042_v8 = vadd.f32 %v1041_v4, %v1040_v48 }
 0x46b   :  { %v1044_v13 = vadd.f32 %v1043_v49, %v1042_v8 }
 0x46d   :  { %v1046_v3 = vadd.f32 %v1045_v21, %v1044_v13 }
 0x46f   :  { %v1048_v11 = vadd.f32 %v1047_v57, %v1046_v3 }
 0x471   :  { %v1050_v46 = vadd.f32 %v1049_v29, %v1048_v11 }
 0x473   :  { %v1051_v28 = vrot.slane %v1050_v46, 4 }
 0x475   :  { %v1052_v24 = vadd.f32 %v1051_v28, %v1050_v46 }
 0x477   :  { %v1053_v54 = vrot.slane %v1052_v24, 2 }
 0x479   :  { %v1054_v40 = vadd.f32 %v1053_v54, %v1052_v24 }
 0x47b   :  { %v1055_v61 = vrot.slane %v1054_v40, 1 }
 0x47d   :  { %v1056_v15 = vadd.f32 %v1055_v61, %v1054_v40 }
 0x47f   :  { %v1057_v9 = vmul.f32 0.0078125, %v1056_v15 }
 0x481   :  { %v1058_v32 = vadd.f32 1e-05, %v1057_v9 }
 0x483   :  { %2110 = vrsqrt.f32 %v1058_v32  ;;  %vm1065_vm8 = vweird.f32 %v1058_v32 }
 0x489   :  { %v2111_v26 = vpop.eup %2110 }
 0x48a   :  { %v1060_v50 = vmul.f32 %v2111_v26, %v1058_v32  ;;  %vm1066_vm7 = vweird.f32 %v2111_v26 }
 0x48b   :  { %vm1067_vm9 = vmor %vm1065_vm8, %vm1066_vm7 }
 0x48c   :  { %v1061_v2 = vmul.f32 %v2111_v26, %v1060_v50 }
 0x48e   :  { %v1062_v42 = vmul.f32 0.5, %v1061_v2 }
 0x490   :  { %v1063_v34 = vsub.f32 1.5, %v1062_v42 }
 0x492   :  { %v1064_v20 = vmul.f32 %v2111_v26, %v1063_v34 }
 0x494   :  { %v1068_v37 = vsel %vm1067_vm9, %v2111_v26, %v1064_v20 }
 0x495   :  { %v1070_v22 = vmul.f32 %v1069_v35, %v1068_v37 }
 0x497   :  { %v1071_v31 = vperm.slane %v1070_v22, 0 }
 0x499   :  { %v1087_v62 = vmul.f32 %v1071_v31, %v1003_v18  ;;  %v1072_v43 = vmul.f32 %v1071_v31, %v2860_v44  ;;  %v1073_v41 = vmul.f32 %v1071_v31, %v2864_v51  ;;  %v1080_v6 = vmul.f32 %v1071_v31, %v2906_v36 }
 0x49a   :  { %v1081_v53 = vmul.f32 %v1071_v31, %v2913_v10  ;;  %v1082_v17 = vmul.f32 %v1071_v31, %v2918_v38  ;;  %v1083_v18 = vmul.f32 %v1071_v31, %v2923_v33  ;;  %v1084_v44 = vmul.f32 %v1071_v31, %v2928_v0 }
 0x49b   :  { %v1107_v16 = vadd.f32 %v2102_v39, %v1087_v62  ;;  %v1092_v7 = vadd.f32 %v2102_v39, %v1072_v43  ;;  %v1093_v23 = vadd.f32 %v2102_v39, %v1073_v41  ;;  %v1100_v60 = vadd.f32 %v2102_v39, %v1080_v6 }
 0x49c   :  { %v1101_v48 = vadd.f32 %v2102_v39, %v1081_v53  ;;  %v1102_v63 = vadd.f32 %v2102_v39, %v1082_v17  ;;  %v1085_v51 = vmul.f32 %v1071_v31, %v2933_v12  ;;  %v1086_v4 = vmul.f32 %v1071_v31, %v2940_v47 }
 0x49d   :  { %v1108_v27 = vpack.c.bf16 %v1093_v23, %v1092_v7  ;;  %v1103_v14 = vadd.f32 %v2102_v39, %v1083_v18  ;;  %v1104_v36 = vadd.f32 %v2102_v39, %v1084_v44  ;;  %v1074_v21 = vmul.f32 %v1071_v31, %v2868_v58 }
 0x49e   :  { %v1112_v8 = vpack.c.bf16 %v1101_v48, %v1100_v60  ;;  %v1105_v49 = vadd.f32 %v2102_v39, %v1085_v51  ;;  %v1106_v10 = vadd.f32 %v2102_v39, %v1086_v4  ;;  %v1075_v3 = vmul.f32 %v1071_v31, %v2872_v1 }
 0x49f   :  { %2008 = vmatmul.msk.bf16.vlgmr.msrb.gmra.mxu3 %vm658_vm3, %v1108_v27  ;;  %v1113_v13 = vpack.c.bf16 %v1103_v14, %v1102_v63  ;;  %v1094_v33 = vadd.f32 %v2102_v39, %v1074_v21  ;;  %v1076_v12 = vmul.f32 %v1071_v31, %v2880_v56  ;;  %v1077_v47 = vmul.f32 %v1071_v31, %v2884_v52  ;;  %v2998_v52 = vld [vmem:[%s3338_s16] ss:$0 sm:$0xff] }
 0x4a0   :  { %v1114_v38 = vpack.c.bf16 %v1105_v49, %v1104_v36  ;;  %v1115_v55 = vpack.c.bf16 %v1107_v16, %v1106_v10  ;;  %v1095_v57 = vadd.f32 %v2102_v39, %v1075_v3  ;;  %v1078_v25 = vmul.f32 %v1071_v31, %v2892_v30 }
 0x4a1   :  { %v1096_v11 = vadd.f32 %v2102_v39, %v1076_v12  ;;  %v1097_v29 = vadd.f32 %v2102_v39, %v1077_v47  ;;  %v1079_v58 = vmul.f32 %v1071_v31, %v2899_v19 }
 0x4a2   :  { %v1109_v0 = vpack.c.bf16 %v1095_v57, %v1094_v33  ;;  %v1098_v28 = vadd.f32 %v2102_v39, %v1078_v25 }
 0x4a3   :  { %v1110_v46 = vpack.c.bf16 %v1097_v29, %v1096_v11  ;;  %v1099_v1 = vadd.f32 %v2102_v39, %v1079_v58 }
 0x4a5   :  { %v1111_v24 = vpack.c.bf16 %v1099_v1, %v1098_v28 }
 0x4af   :  { %2009 = vmatmul.msk.bf16.gmra.mxu3 %vm658_vm3, %v1109_v0 }
 0x4bf   :  { %2010 = vmatmul.msk.bf16.gmra.mxu3 %vm658_vm3, %v1110_v46 }
 0x4cf   :  { %2011 = vmatmul.msk.bf16.gmra.mxu3 %vm658_vm3, %v1111_v24 }
 0x4df   :  { %2012 = vmatmul.msk.bf16.gmra.mxu3 %vm658_vm3, %v1112_v8 }
 0x4ef   :  { %2013 = vmatmul.msk.bf16.gmra.mxu3 %vm658_vm3, %v1113_v13 }
 0x4ff   :  { %2014 = vmatmul.msk.bf16.gmra.mxu3 %vm658_vm3, %v1114_v38 }
 0x50f   :  { %2015 = vmatmul.msk.bf16.gmra.mxu3 %vm658_vm3, %v1115_v55 }
 0x522   :  { %v1185_v56 = vpop.f32.mrf.mxu3 }
 0x523   :  { %v3001_v30 = vadd.f32 %v2998_v52, %v1185_v56 }
 0x525   :  { %v1225_v5 = vmax.f32 %v3001_v30, 0.0 }
 0x527   :  { %v1241_v45 = vsel %vm658_vm3, %v1225_v5, 0.0 }
 0x52a   :  { %v1187_v19 = vpop.f32.mrf.mxu3 }
 0x52b   :  { %v3005_v54 = vadd.f32 %v2998_v52, %v1187_v19 }
 0x52d   :  { %v1226_v40 = vmax.f32 %v3005_v54, 0.0 }
 0x52f   :  { %v1242_v61 = vsel %vm658_vm3, %v1226_v40, 0.0 }
 0x530   :  { %v1243_v59 = vadd.f32 %v1242_v61, %v1241_v45 }
 0x532   :  { %v1190_v15 = vpop.f32.mrf.mxu3 }
 0x533   :  { %v3015_v9 = vadd.f32 %v2998_v52, %v1190_v15 }
 0x535   :  { %v1227_v32 = vmax.f32 %v3015_v9, 0.0 }
 0x537   :  { %v1244_v26 = vsel %vm658_vm3, %v1227_v32, 0.0 }
 0x538   :  { %v1245_v50 = vadd.f32 %v1244_v26, %v1243_v59 }
 0x53a   :  { %v1192_v2 = vpop.f32.mrf.mxu3 }
 0x53b   :  { %v3022_v42 = vadd.f32 %v2998_v52, %v1192_v2 }
 0x53d   :  { %v1228_v34 = vmax.f32 %v3022_v42, 0.0 }
 0x53f   :  { %v1246_v20 = vsel %vm658_vm3, %v1228_v34, 0.0 }
 0x540   :  { %v1247_v35 = vadd.f32 %v1246_v20, %v1245_v50 }
 0x542   :  { %v1195_v37 = vpop.f32.mrf.mxu3 }
 0x543   :  { %v3029_v22 = vadd.f32 %v2998_v52, %v1195_v37 }
 0x545   :  { %v1229_v31 = vmax.f32 %v3029_v22, 0.0 }
 0x547   :  { %v1248_v39 = vsel %vm658_vm3, %v1229_v31, 0.0 }
 0x548   :  { %v1249_v62 = vadd.f32 %v1248_v39, %v1247_v35 }
 0x54a   :  { %v1197_v43 = vpop.f32.mrf.mxu3 }
 0x54b   :  { %v3036_v53 = vadd.f32 %v2998_v52, %v1197_v43 }
 0x54d   :  { %v1230_v48 = vmax.f32 %v3036_v53, 0.0 }
 0x54f   :  { %v1250_v51 = vsel %vm658_vm3, %v1230_v48, 0.0 }
 0x550   :  { %v1251_v13 = vadd.f32 %v1250_v51, %v1249_v62 }
 0x552   :  { %v1200_v41 = vpop.f32.mrf.mxu3 }
 0x553   :  { %v3039_v60 = vadd.f32 %v2998_v52, %v1200_v41 }
 0x555   :  { %v1231_v44 = vmax.f32 %v3039_v60, 0.0 }
 0x557   :  { %v1252_v36 = vsel %vm658_vm3, %v1231_v44, 0.0 }
 0x558   :  { %v1253_v3 = vadd.f32 %v1252_v36, %v1251_v13 }
 0x55a   :  { %v1202_v16 = vpop.f32.mrf.mxu3 }
 0x55b   :  { %v3043_v18 = vadd.f32 %v2998_v52, %v1202_v16 }
 0x55d   :  { %v1232_v4 = vmax.f32 %v3043_v18, 0.0 }
 0x55f   :  { %v1254_v38 = vsel %vm658_vm3, %v1232_v4, 0.0 }
 0x560   :  { %v1255_v12 = vadd.f32 %v1254_v38, %v1253_v3 }
 0x562   :  { %v1205_v7 = vpop.f32.mrf.mxu3 }
 0x563   :  { %v3047_v63 = vadd.f32 %v2998_v52, %v1205_v7 }
 0x565   :  { %v1233_v49 = vmax.f32 %v3047_v63, 0.0 }
 0x567   :  { %v1256_v33 = vsel %vm658_vm3, %v1233_v49, 0.0 }
 0x568   :  { %v1257_v46 = vadd.f32 %v1256_v33, %v1255_v12 }
 0x56a   :  { %v1207_v23 = vpop.f32.mrf.mxu3 }
 0x56b   :  { %v3052_v8 = vadd.f32 %v2998_v52, %v1207_v23 }
 0x56d   :  { %v1234_v55 = vmax.f32 %v3052_v8, 0.0 }
 0x56f   :  { %v1258_v47 = vsel %vm658_vm3, %v1234_v55, 0.0 }
 0x570   :  { %v1259_v24 = vadd.f32 %v1258_v47, %v1257_v46 }
 0x572   :  { %v1210_v27 = vpop.f32.mrf.mxu3 }
 0x573   :  { %v3059_v10 = vadd.f32 %v2998_v52, %v1210_v27 }
 0x575   :  { %v1235_v57 = vmax.f32 %v3059_v10, 0.0 }
 0x577   :  { %v1260_v58 = vsel %vm658_vm3, %v1235_v57, 0.0 }
 0x578   :  { %v1261_v45 = vadd.f32 %v1260_v58, %v1259_v24 }
 0x57a   :  { %v1212_v6 = vpop.f32.mrf.mxu3 }
 0x57b   :  { %v3066_v21 = vadd.f32 %v2998_v52, %v1212_v6 }
 0x57d   :  { %v1236_v11 = vmax.f32 %v3066_v21, 0.0 }
 0x57f   :  { %v1262_v56 = vsel %vm658_vm3, %v1236_v11, 0.0 }
 0x580   :  { %v1263_v15 = vadd.f32 %v1262_v56, %v1261_v45 }
 0x582   :  { %v1215_v17 = vpop.f32.mrf.mxu3 }
 0x583   :  { %v3073_v0 = vadd.f32 %v2998_v52, %v1215_v17 }
 0x585   :  { %v1237_v28 = vmax.f32 %v3073_v0, 0.0 }
 0x587   :  { %v1264_v61 = vsel %vm658_vm3, %v1237_v28, 0.0 }
 0x588   :  { %v1265_v50 = vadd.f32 %v1264_v61, %v1263_v15 }
 0x58a   :  { %v1217_v14 = vpop.f32.mrf.mxu3 }
 0x58b   :  { %v3080_v29 = vadd.f32 %v2998_v52, %v1217_v14 }
 0x58d   :  { %v1238_v19 = vmax.f32 %v3080_v29, 0.0 }
 0x58f   :  { %v1266_v26 = vsel %vm658_vm3, %v1238_v19, 0.0 }
 0x590   :  { %v1267_v37 = vadd.f32 %v1266_v26, %v1265_v50 }
 0x592   :  { %v1220_v25 = vpop.f32.mrf.mxu3 }
 0x593   :  { %v3087_v1 = vadd.f32 %v2998_v52, %v1220_v25 }
 0x595   :  { %v1239_v59 = vmax.f32 %v3087_v1, 0.0 }
 0x597   :  { %v1268_v20 = vsel %vm658_vm3, %v1239_v59, 0.0 }
 0x598   :  { %v1269_v62 = vadd.f32 %v1268_v20, %v1267_v37 }
 0x59a   :  { %v1222_v2 = vpop.f32.mrf.mxu3 }
 0x59b   :  { %v3104_v35 = vadd.f32 %v2998_v52, %v1222_v2 }
 0x59d   :  { %v1240_v39 = vmax.f32 %v3104_v35, 0.0 }
 0x59f   :  { %v1270_v43 = vsel %vm658_vm3, %v1240_v39, 0.0 }
 0x5a0   :  { %v1271_v41 = vadd.f32 %v1270_v43, %v1269_v62 }
 0x5a2   :  { %v1272_v16 = vrot.slane %v1271_v41, 4 }
 0x5a4   :  { %v1273_v7 = vadd.f32 %v1272_v16, %v1271_v41 }
 0x5a6   :  { %v1274_v23 = vrot.slane %v1273_v7, 2 }
 0x5a8   :  { %v1275_v27 = vadd.f32 %v1274_v23, %v1273_v7 }
 0x5aa   :  { %v1276_v6 = vrot.slane %v1275_v27, 1 }
 0x5ac   :  { %v1277_v53 = vadd.f32 %v1276_v6, %v1275_v27 }
 0x5ae   :  { %v1278_v17 = vmul.f32 0.0078125, %v1277_v53 }
 0x5b0   :  { %v3110_v51 = vsub.f32 %v1225_v5, %v1278_v17  ;;  %v3114_v52 = vsub.f32 %v1226_v40, %v1278_v17  ;;  %v3118_v14 = vsub.f32 %v1227_v32, %v1278_v17  ;;  %v3122_v36 = vsub.f32 %v1228_v34, %v1278_v17 }
 0x5b1   :  { %v3126_v13 = vsub.f32 %v1229_v31, %v1278_v17  ;;  %v3134_v40 = vsub.f32 %v1230_v48, %v1278_v17  ;;  %v3142_v22 = vsub.f32 %v1231_v44, %v1278_v17  ;;  %v3149_v48 = vsub.f32 %v1232_v4, %v1278_v17 }
 0x5b2   :  { %v1295_v30 = vmul.f32 %v3110_v51, %v3110_v51  ;;  %v1296_v5 = vmul.f32 %v3114_v52, %v3114_v52  ;;  %v1297_v54 = vmul.f32 %v3118_v14, %v3118_v14  ;;  %v1298_v9 = vmul.f32 %v3122_v36, %v3122_v36 }
 0x5b3   :  { %v1299_v31 = vmul.f32 %v3126_v13, %v3126_v13  ;;  %v1300_v33 = vmul.f32 %v3134_v40, %v3134_v40  ;;  %v3156_v60 = vsub.f32 %v1233_v49, %v1278_v17  ;;  %v1301_v44 = vmul.f32 %v3142_v22, %v3142_v22 }
 0x5b4   :  { %v1311_v32 = vsel %vm658_vm3, %v1295_v30, 0.0  ;;  %v1312_v42 = vsel %vm658_vm3, %v1296_v5, 0.0  ;;  %v1314_v38 = vsel %vm658_vm3, %v1297_v54, 0.0  ;;  %v1316_v12 = vsel %vm658_vm3, %v1298_v9, 0.0  ;;  %v2082_v54 = vld [vmem:[%s3340_s19 + $0x10] sm:$0xff] }
 0x5b5   :  { %v1313_v34 = vadd.f32 %v1312_v42, %v1311_v32  ;;  %v1318_v46 = vsel %vm658_vm3, %v1299_v31, 0.0  ;;  %v3163_v18 = vsub.f32 %v1234_v55, %v1278_v17  ;;  %v1302_v4 = vmul.f32 %v3149_v48, %v3149_v48  ;;  %v2081_v42 = vld [vmem:[%s3340_s19 + $0x8] sm:$0xff]  ;;  %v2080_v31 = vld [vmem:[%s3340_s19] sm:$0xff] }
 0x5b6   :  { %v1320_v58 = vsel %vm658_vm3, %v1300_v33, 0.0  ;;  %v3170_v63 = vsub.f32 %v1235_v57, %v1278_v17  ;;  %v1303_v49 = vmul.f32 %v3156_v60, %v3156_v60  ;;  %v1322_v56 = vsel %vm658_vm3, %v1301_v44, 0.0 }
 0x5b7   :  { %v1315_v3 = vadd.f32 %v1314_v38, %v1313_v34  ;;  %v3177_v8 = vsub.f32 %v1236_v11, %v1278_v17  ;;  %v1304_v55 = vmul.f32 %v3163_v18, %v3163_v18  ;;  %v1324_v61 = vsel %vm658_vm3, %v1302_v4, 0.0 }
 0x5b8   :  { %v3184_v10 = vsub.f32 %v1237_v28, %v1278_v17  ;;  %v1305_v57 = vmul.f32 %v3170_v63, %v3170_v63  ;;  %v1326_v26 = vsel %vm658_vm3, %v1303_v49, 0.0  ;;  %v3191_v21 = vsub.f32 %v1238_v19, %v1278_v17 }
 0x5b9   :  { %v1317_v47 = vadd.f32 %v1316_v12, %v1315_v3  ;;  %v1306_v11 = vmul.f32 %v3177_v8, %v3177_v8  ;;  %v1328_v2 = vsel %vm658_vm3, %v1304_v55, 0.0  ;;  %v3198_v0 = vsub.f32 %v1239_v59, %v1278_v17 }
 0x5ba   :  { %v1307_v28 = vmul.f32 %v3184_v10, %v3184_v10  ;;  %v1330_v35 = vsel %vm658_vm3, %v1305_v57, 0.0  ;;  %v1294_v62 = vsub.f32 %v1240_v39, %v1278_v17  ;;  %v1308_v29 = vmul.f32 %v3191_v21, %v3191_v21  ;;  %v2083_v17 = vld [vmem:[%s3340_s19 + $0x18] sm:$0xff] }
 0x5bb   :  { %v1319_v25 = vadd.f32 %v1318_v46, %v1317_v47  ;;  %v1332_v19 = vsel %vm658_vm3, %v1306_v11, 0.0  ;;  %v1309_v41 = vmul.f32 %v3198_v0, %v3198_v0  ;;  %1471 = vmatpush.bf16.msrb.mxu0 %v2083_v17 }
 0x5bc   :  { %v1334_v1 = vsel %vm658_vm3, %v1307_v28, 0.0  ;;  %v1310_v16 = vmul.f32 %v1294_v62, %v1294_v62  ;;  %v1336_v7 = vsel %vm658_vm3, %v1308_v29, 0.0 }
 0x5bd   :  { %v1321_v24 = vadd.f32 %v1320_v58, %v1319_v25  ;;  %v1338_v27 = vsel %vm658_vm3, %v1309_v41, 0.0  ;;  %v1360_v58 = vld [vmem:[%s3341_s17] sm:$0x1] }
 0x5be   :  { %v1340_v39 = vsel %vm658_vm3, %v1310_v16, 0.0 }
 0x5bf   :  { %v1323_v45 = vadd.f32 %v1322_v56, %v1321_v24  ;;  %1472 = vmatpush.bf16.msrb.mxu0 %v2082_v54 }
 0x5c1   :  { %v1325_v15 = vadd.f32 %v1324_v61, %v1323_v45  ;;  %v2104_v45 = vld [vmem:[%s3339_s18] ss:$0 sm:$0xff] }
 0x5c3   :  { %v1327_v50 = vadd.f32 %v1326_v26, %v1325_v15  ;;  %1473 = vmatpush.bf16.msrb.mxu0 %v2081_v42 }
 0x5c5   :  { %v1329_v20 = vadd.f32 %v1328_v2, %v1327_v50 }
 0x5c7   :  { %v1331_v37 = vadd.f32 %v1330_v35, %v1329_v20  ;;  %1474 = vmatpush.bf16.msrb.mxu0 %v2080_v31 }
 0x5c9   :  { %v1333_v43 = vadd.f32 %v1332_v19, %v1331_v37 }
 0x5cb   :  { %v1335_v59 = vadd.f32 %v1334_v1, %v1333_v43 }
 0x5cd   :  { %v1337_v23 = vadd.f32 %v1336_v7, %v1335_v59 }
 0x5cf   :  { %v1339_v6 = vadd.f32 %v1338_v27, %v1337_v23 }
 0x5d1   :  { %v1341_v53 = vadd.f32 %v1340_v39, %v1339_v6 }
 0x5d3   :  { %v1342_v30 = vrot.slane %v1341_v53, 4 }
 0x5d5   :  { %v1343_v5 = vadd.f32 %v1342_v30, %v1341_v53 }
 0x5d7   :  { %v1344_v9 = vrot.slane %v1343_v5, 2 }
 0x5d9   :  { %v1345_v32 = vadd.f32 %v1344_v9, %v1343_v5 }
 0x5db   :  { %v1346_v34 = vrot.slane %v1345_v32, 1 }
 0x5dd   :  { %v1347_v38 = vadd.f32 %v1346_v34, %v1345_v32 }
 0x5df   :  { %v1348_v3 = vmul.f32 0.0078125, %v1347_v38 }
 0x5e1   :  { %v1349_v33 = vadd.f32 1e-05, %v1348_v3 }
 0x5e3   :  { %2112 = vrsqrt.f32 %v1349_v33  ;;  %vm1356_vm11 = vweird.f32 %v1349_v33 }
 0x5e9   :  { %v2113_v12 = vpop.eup %2112 }
 0x5ea   :  { %v1351_v47 = vmul.f32 %v2113_v12, %v1349_v33  ;;  %vm1357_vm10 = vweird.f32 %v2113_v12 }
 0x5eb   :  { %vm1358_vm12 = vmor %vm1356_vm11, %vm1357_vm10 }
 0x5ec   :  { %v1352_v44 = vmul.f32 %v2113_v12, %v1351_v47 }
 0x5ee   :  { %v1353_v46 = vmul.f32 0.5, %v1352_v44 }
 0x5f0   :  { %v1354_v25 = vsub.f32 1.5, %v1353_v46 }
 0x5f2   :  { %v1355_v4 = vmul.f32 %v2113_v12, %v1354_v25 }
 0x5f4   :  { %v1359_v24 = vsel %vm1358_vm12, %v2113_v12, %v1355_v4 }
 0x5f5   :  { %v1361_v49 = vmul.f32 %v1360_v58, %v1359_v24 }
 0x5f7   :  { %v1362_v56 = vperm.slane %v1361_v49, 0 }
 0x5f9   :  { %v1363_v55 = vmul.f32 %v1362_v56, %v3110_v51  ;;  %v1364_v61 = vmul.f32 %v1362_v56, %v3114_v52  ;;  %v1378_v26 = vmul.f32 %v1362_v56, %v1294_v62  ;;  %v1371_v11 = vmul.f32 %v1362_v56, %v3156_v60 }
 0x5fa   :  { %v1372_v2 = vmul.f32 %v1362_v56, %v3163_v18  ;;  %v1373_v20 = vmul.f32 %v1362_v56, %v3170_v63  ;;  %v1374_v28 = vmul.f32 %v1362_v56, %v3177_v8  ;;  %v1375_v51 = vmul.f32 %v1362_v56, %v3184_v10 }
 0x5fb   :  { %v1383_v15 = vadd.f32 %v2104_v45, %v1363_v55  ;;  %v1384_v57 = vadd.f32 %v2104_v45, %v1364_v61  ;;  %v1391_v35 = vadd.f32 %v2104_v45, %v1371_v11  ;;  %v1376_v19 = vmul.f32 %v1362_v56, %v3191_v21 }
 0x5fc   :  { %v1392_v37 = vadd.f32 %v2104_v45, %v1372_v2  ;;  %v1393_v29 = vadd.f32 %v2104_v45, %v1373_v20  ;;  %v1394_v52 = vadd.f32 %v2104_v45, %v1374_v28  ;;  %v1377_v62 = vmul.f32 %v1362_v56, %v3198_v0 }
 0x5fd   :  { %v1399_v50 = vpack.c.bf16 %v1384_v57, %v1383_v15  ;;  %v1395_v60 = vadd.f32 %v2104_v45, %v1375_v51  ;;  %v1398_v41 = vadd.f32 %v2104_v45, %v1378_v26  ;;  %v1396_v1 = vadd.f32 %v2104_v45, %v1376_v19 }
 0x5fe   :  { %v1403_v43 = vpack.c.bf16 %v1392_v37, %v1391_v35  ;;  %v1404_v18 = vpack.c.bf16 %v1394_v52, %v1393_v29  ;;  %v1397_v63 = vadd.f32 %v2104_v45, %v1377_v62  ;;  %v1365_v16 = vmul.f32 %v1362_v56, %v3118_v14 }
 0x5ff   :  { %2032 = vmatmul.msk.bf16.vlgmr.msrb.gmra.mxu0 %vm658_vm3, %v1399_v50  ;;  %v1405_v59 = vpack.c.bf16 %v1396_v1, %v1395_v60  ;;  %v1366_v7 = vmul.f32 %v1362_v56, %v3122_v36  ;;  %v1367_v21 = vmul.f32 %v1362_v56, %v3126_v13  ;;  %v1368_v0 = vmul.f32 %v1362_v56, %v3134_v40  ;;  %v3256_v13 = vld [vmem:[%s3342_s20] ss:$0 sm:$0xff] }
 0x600   :  { %v1406_v8 = vpack.c.bf16 %v1398_v41, %v1397_v63  ;;  %v1385_v23 = vadd.f32 %v2104_v45, %v1365_v16  ;;  %v1369_v17 = vmul.f32 %v1362_v56, %v3142_v22  ;;  %v1370_v14 = vmul.f32 %v1362_v56, %v3149_v48 }
 0x601   :  { %v1386_v10 = vadd.f32 %v2104_v45, %v1366_v7  ;;  %v1387_v6 = vadd.f32 %v2104_v45, %v1367_v21  ;;  %v1388_v39 = vadd.f32 %v2104_v45, %v1368_v0 }
 0x602   :  { %v1389_v30 = vadd.f32 %v2104_v45, %v1369_v17  ;;  %v1390_v36 = vadd.f32 %v2104_v45, %v1370_v14 }
 0x603   :  { %v1400_v27 = vpack.c.bf16 %v1386_v10, %v1385_v23  ;;  %v1401_v53 = vpack.c.bf16 %v1388_v39, %v1387_v6 }
 0x604   :  { %v1402_v5 = vpack.c.bf16 %v1390_v36, %v1389_v30 }
 0x60f   :  { %2033 = vmatmul.msk.bf16.gmra.mxu0 %vm658_vm3, %v1400_v27 }
 0x61f   :  { %2034 = vmatmul.msk.bf16.gmra.mxu0 %vm658_vm3, %v1401_v53 }
 0x62f   :  { %2035 = vmatmul.msk.bf16.gmra.mxu0 %vm658_vm3, %v1402_v5 }
 0x63f   :  { %2036 = vmatmul.msk.bf16.gmra.mxu0 %vm658_vm3, %v1403_v43 }
 0x64f   :  { %2037 = vmatmul.msk.bf16.gmra.mxu0 %vm658_vm3, %v1404_v18 }
 0x65f   :  { %2038 = vmatmul.msk.bf16.gmra.mxu0 %vm658_vm3, %v1405_v59 }
 0x66f   :  { %2039 = vmatmul.msk.bf16.gmra.mxu0 %vm658_vm3, %v1406_v8 }
 0x67c   :  { %v1476_v40 = vpop.f32.mrf.mxu0 }
 0x67d   :  { %v1477_v22 = vadd.f32 %v3256_v13, %v1476_v40 }
 0x67f   :  { %v1516_v48 = vsub.f32 0.0, %v1477_v22 }
 0x681   :  { %v1532_v54 = vmul.f32 1.442695, %v1516_v48 }
 0x683   :  { %2114 = vpow2.f32 %v1532_v54 }
 0x684   :  { %v1478_v9 = vpop.f32.mrf.mxu0 }
 0x685   :  { %v1479_v32 = vadd.f32 %v3256_v13, %v1478_v9 }
 0x687   :  { %v1517_v42 = vsub.f32 0.0, %v1479_v32 }
 0x689   :  { %v2115_v34 = vpop.eup %2114  ;;  %v1534_v31 = vmul.f32 1.442695, %v1517_v42 }
 0x68a   :  { %v1564_v38 = vadd.f32 1.0, %v2115_v34 }
 0x68b   :  { %2116 = vpow2.f32 %v1534_v31 }
 0x68c   :  { %2118 = vrcp.f32 %v1564_v38  ;;  %v1481_v3 = vpop.f32.mrf.mxu0  ;;  %v1591_v56 = vand.u32 2147483648, %v1564_v38  ;;  %v1589_v55 = vand.u32 2147483647, %v1564_v38  ;;  %vm1585_vm14 = vweird.f32 %v1564_v38 }
 0x68d   :  { %v1482_v33 = vadd.f32 %v3256_v13, %v1481_v3 }
 0x68e   :  { %v1592_v11 = vor.u32 1.1754944e-38, %v1591_v56  ;;  %vm1590_vm0 = vcmp.eq.f32.partialorder %v1589_v55, 8.507059e+37 }
 0x68f   :  { %v1518_v12 = vsub.f32 0.0, %v1482_v33 }
 0x691   :  { %v2117_v47 = vpop.eup %2116  ;;  %v1536_v44 = vmul.f32 1.442695, %v1518_v12 }
 0x692   :  { %v2119_v46 = vpop.eup %2118  ;;  %v1565_v25 = vadd.f32 1.0, %v2117_v47 }
 0x693   :  { %v1581_v4 = vmul.f32 %v2119_v46, %v1564_v38  ;;  %2120 = vpow2.f32 %v1536_v44  ;;  %vm1586_vm13 = vweird.f32 %v2119_v46 }
 0x694   :  { %2122 = vrcp.f32 %v1565_v25  ;;  %v1483_v58 = vpop.f32.mrf.mxu0  ;;  %vm1587_vm15 = vmor %vm1585_vm14, %vm1586_vm13  ;;  %v1606_v52 = vand.u32 2147483648, %v1565_v25  ;;  %v1604_v62 = vand.u32 2147483647, %v1565_v25  ;;  %vm1600_vm2 = vweird.f32 %v1565_v25 }
 0x695   :  { %v1582_v24 = vsub.f32 1.0, %v1581_v4  ;;  %v1484_v49 = vadd.f32 %v3256_v13, %v1483_v58 }
 0x696   :  { %v1607_v63 = vor.u32 1.1754944e-38, %v1606_v52  ;;  %vm1605_vm4 = vcmp.eq.f32.partialorder %v1604_v62, 8.507059e+37 }
 0x697   :  { %v1583_v45 = vmul.f32 %v2119_v46, %v1582_v24  ;;  %v1519_v61 = vsub.f32 0.0, %v1484_v49 }
 0x699   :  { %v2121_v15 = vpop.eup %2120  ;;  %v1584_v57 = vadd.f32 %v2119_v46, %v1583_v45  ;;  %v1538_v26 = vmul.f32 1.442695, %v1519_v61 }
 0x69a   :  { %v2123_v50 = vpop.eup %2122  ;;  %v1566_v2 = vadd.f32 1.0, %v2121_v15 }
 0x69b   :  { %v1588_v20 = vsel %vm1587_vm15, %v2119_v46, %v1584_v57  ;;  %v1596_v28 = vmul.f32 %v2123_v50, %v1565_v25  ;;  %2124 = vpow2.f32 %v1538_v26  ;;  %vm1601_vm1 = vweird.f32 %v2123_v50 }
 0x69c   :  { %v1593_v35 = vsel %vm1590_vm0, %v1592_v11, %v1588_v20  ;;  %2126 = vrcp.f32 %v1566_v2  ;;  %v1486_v37 = vpop.f32.mrf.mxu0  ;;  %vm1602_vm3 = vmor %vm1600_vm2, %vm1601_vm1  ;;  %v1621_v21 = vand.u32 2147483648, %v1566_v2  ;;  %v1619_v6 = vand.u32 2147483647, %v1566_v2 }
 0x69d   :  { %1820 = vst [vmem:[%s3343_s21] sm:$0xff] %v1593_v35  ;;  %v1597_v51 = vsub.f32 1.0, %v1596_v28  ;;  %v1487_v29 = vadd.f32 %v3256_v13, %v1486_v37  ;;  %vm1615_vm6 = vweird.f32 %v1566_v2 }
 0x69e   :  { %v1622_v36 = vor.u32 1.1754944e-38, %v1621_v21  ;;  %vm1620_vm8 = vcmp.eq.f32.partialorder %v1619_v6, 8.507059e+37 }
 0x69f   :  { %v1598_v19 = vmul.f32 %v2123_v50, %v1597_v51  ;;  %v1520_v43 = vsub.f32 0.0, %v1487_v29 }
 0x6a1   :  { %v2125_v60 = vpop.eup %2124  ;;  %v1599_v41 = vadd.f32 %v2123_v50, %v1598_v19  ;;  %v1540_v18 = vmul.f32 1.442695, %v1520_v43 }
 0x6a2   :  { %v2127_v1 = vpop.eup %2126  ;;  %v1567_v59 = vadd.f32 1.0, %v2125_v60 }
 0x6a3   :  { %v1603_v8 = vsel %vm1602_vm3, %v2123_v50, %v1599_v41  ;;  %v1611_v16 = vmul.f32 %v2127_v1, %v1566_v2  ;;  %2128 = vpow2.f32 %v1540_v18  ;;  %vm1616_vm5 = vweird.f32 %v2127_v1 }
 0x6a4   :  { %v1608_v7 = vsel %vm1605_vm4, %v1607_v63, %v1603_v8  ;;  %2130 = vrcp.f32 %v1567_v59  ;;  %v1488_v23 = vpop.f32.mrf.mxu0  ;;  %vm1617_vm7 = vmor %vm1615_vm6, %vm1616_vm5  ;;  %v1636_v42 = vand.u32 2147483648, %v1567_v59  ;;  %v1634_v31 = vand.u32 2147483647, %v1567_v59 }
 0x6a5   :  { %1821 = vst [vmem:[%s3343_s21 + $0x8] sm:$0xff] %v1608_v7  ;;  %v1612_v10 = vsub.f32 1.0, %v1611_v16  ;;  %v1489_v27 = vadd.f32 %v3256_v13, %v1488_v23  ;;  %vm1630_vm10 = vweird.f32 %v1567_v59 }
 0x6a6   :  { %v1637_v44 = vor.u32 1.1754944e-38, %v1636_v42  ;;  %vm1635_vm12 = vcmp.eq.f32.partialorder %v1634_v31, 8.507059e+37 }
 0x6a7   :  { %v1613_v0 = vmul.f32 %v2127_v1, %v1612_v10  ;;  %v1521_v39 = vsub.f32 0.0, %v1489_v27 }
 0x6a9   :  { %v2129_v53 = vpop.eup %2128  ;;  %v1614_v17 = vadd.f32 %v2127_v1, %v1613_v0  ;;  %v1542_v14 = vmul.f32 1.442695, %v1521_v39 }
 0x6aa   :  { %v2131_v30 = vpop.eup %2130  ;;  %v1568_v5 = vadd.f32 1.0, %v2129_v53 }
 0x6ab   :  { %v1618_v40 = vsel %vm1617_vm7, %v2127_v1, %v1614_v17  ;;  %v1626_v22 = vmul.f32 %v2131_v30, %v1567_v59  ;;  %2132 = vpow2.f32 %v1542_v14  ;;  %vm1631_vm9 = vweird.f32 %v2131_v30 }
 0x6ac   :  { %v1623_v48 = vsel %vm1620_vm8, %v1622_v36, %v1618_v40  ;;  %2134 = vrcp.f32 %v1568_v5  ;;  %v1491_v54 = vpop.f32.mrf.mxu0  ;;  %vm1632_vm11 = vmor %vm1630_vm10, %vm1631_vm9  ;;  %v1651_v45 = vand.u32 2147483648, %v1568_v5  ;;  %v1649_v61 = vand.u32 2147483647, %v1568_v5 }
 0x6ad   :  { %1822 = vst [vmem:[%s3343_s21 + $0x10] sm:$0xff] %v1623_v48  ;;  %v1627_v9 = vsub.f32 1.0, %v1626_v22  ;;  %v1492_v32 = vadd.f32 %v3256_v13, %v1491_v54  ;;  %vm1645_vm14 = vweird.f32 %v1568_v5 }
 0x6ae   :  { %v1652_v2 = vor.u32 1.1754944e-38, %v1651_v45  ;;  %vm1650_vm0 = vcmp.eq.f32.partialorder %v1649_v61, 8.507059e+37 }
 0x6af   :  { %v1628_v34 = vmul.f32 %v2131_v30, %v1627_v9  ;;  %v1522_v38 = vsub.f32 0.0, %v1492_v32 }
 0x6b1   :  { %v2133_v3 = vpop.eup %2132  ;;  %v1629_v33 = vadd.f32 %v2131_v30, %v1628_v34  ;;  %v1544_v12 = vmul.f32 1.442695, %v1522_v38 }
 0x6b2   :  { %v2135_v47 = vpop.eup %2134  ;;  %v1569_v46 = vadd.f32 1.0, %v2133_v3 }
 0x6b3   :  { %v1633_v25 = vsel %vm1632_vm11, %v2131_v30, %v1629_v33  ;;  %v1641_v4 = vmul.f32 %v2135_v47, %v1568_v5  ;;  %2136 = vpow2.f32 %v1544_v12  ;;  %vm1646_vm13 = vweird.f32 %v2135_v47 }
 0x6b4   :  { %v1638_v58 = vsel %vm1635_vm12, %v1637_v44, %v1633_v25  ;;  %2138 = vrcp.f32 %v1569_v46  ;;  %v1493_v24 = vpop.f32.mrf.mxu0  ;;  %vm1647_vm15 = vmor %vm1645_vm14, %vm1646_vm13  ;;  %v1666_v19 = vand.u32 2147483648, %v1569_v46  ;;  %v1664_v43 = vand.u32 2147483647, %v1569_v46 }
 0x6b5   :  { %1823 = vst [vmem:[%s3343_s21 + $0x18] sm:$0xff] %v1638_v58  ;;  %v1642_v49 = vsub.f32 1.0, %v1641_v4  ;;  %v1494_v56 = vadd.f32 %v3256_v13, %v1493_v24  ;;  %vm1660_vm2 = vweird.f32 %v1569_v46 }
 0x6b6   :  { %v1667_v59 = vor.u32 1.1754944e-38, %v1666_v19  ;;  %vm1665_vm4 = vcmp.eq.f32.partialorder %v1664_v43, 8.507059e+37 }
 0x6b7   :  { %v1643_v55 = vmul.f32 %v2135_v47, %v1642_v49  ;;  %v1523_v15 = vsub.f32 0.0, %v1494_v56 }
 0x6b9   :  { %v2137_v57 = vpop.eup %2136  ;;  %v1644_v26 = vadd.f32 %v2135_v47, %v1643_v55  ;;  %v1546_v50 = vmul.f32 1.442695, %v1523_v15 }
 0x6ba   :  { %v2139_v11 = vpop.eup %2138  ;;  %v1570_v20 = vadd.f32 1.0, %v2137_v57 }
 0x6bb   :  { %v1648_v28 = vsel %vm1647_vm15, %v2135_v47, %v1644_v26  ;;  %v1656_v35 = vmul.f32 %v2139_v11, %v1569_v46  ;;  %2140 = vpow2.f32 %v1546_v50  ;;  %vm1661_vm1 = vweird.f32 %v2139_v11 }
 0x6bc   :  { %v1653_v37 = vsel %vm1650_vm0, %v1652_v2, %v1648_v28  ;;  %2142 = vrcp.f32 %v1570_v20  ;;  %v1496_v51 = vpop.f32.mrf.mxu0  ;;  %vm1662_vm3 = vmor %vm1660_vm2, %vm1661_vm1  ;;  %v1681_v0 = vand.u32 2147483648, %v1570_v20  ;;  %v1679_v39 = vand.u32 2147483647, %v1570_v20 }
 0x6bd   :  { %1824 = vst [vmem:[%s3343_s21 + $0x20] sm:$0xff] %v1653_v37  ;;  %v1657_v29 = vsub.f32 1.0, %v1656_v35  ;;  %v1497_v52 = vadd.f32 %v3256_v13, %v1496_v51  ;;  %vm1675_vm6 = vweird.f32 %v1570_v20 }
 0x6be   :  { %v1682_v5 = vor.u32 1.1754944e-38, %v1681_v0  ;;  %vm1680_vm8 = vcmp.eq.f32.partialorder %v1679_v39, 8.507059e+37 }
 0x6bf   :  { %v1658_v62 = vmul.f32 %v2139_v11, %v1657_v29  ;;  %v1524_v60 = vsub.f32 0.0, %v1497_v52 }
 0x6c1   :  { %v2141_v41 = vpop.eup %2140  ;;  %v1659_v18 = vadd.f32 %v2139_v11, %v1658_v62  ;;  %v1548_v1 = vmul.f32 1.442695, %v1524_v60 }
 0x6c2   :  { %v2143_v63 = vpop.eup %2142  ;;  %v1571_v8 = vadd.f32 1.0, %v2141_v41 }
 0x6c3   :  { %v1663_v16 = vsel %vm1662_vm3, %v2139_v11, %v1659_v18  ;;  %v1671_v7 = vmul.f32 %v2143_v63, %v1570_v20  ;;  %2144 = vpow2.f32 %v1548_v1  ;;  %vm1676_vm5 = vweird.f32 %v2143_v63 }
 0x6c4   :  { %v1668_v23 = vsel %vm1665_vm4, %v1667_v59, %v1663_v16  ;;  %2146 = vrcp.f32 %v1571_v8  ;;  %v1498_v10 = vpop.f32.mrf.mxu0  ;;  %vm1677_vm7 = vmor %vm1675_vm6, %vm1676_vm5  ;;  %v1696_v34 = vand.u32 2147483648, %v1571_v8  ;;  %v1694_v38 = vand.u32 2147483647, %v1571_v8 }
 0x6c5   :  { %1825 = vst [vmem:[%s3343_s21 + $0x28] sm:$0xff] %v1668_v23  ;;  %v1672_v27 = vsub.f32 1.0, %v1671_v7  ;;  %v1499_v21 = vadd.f32 %v3256_v13, %v1498_v10  ;;  %vm1690_vm10 = vweird.f32 %v1571_v8 }
 0x6c6   :  { %v1697_v46 = vor.u32 1.1754944e-38, %v1696_v34  ;;  %vm1695_vm12 = vcmp.eq.f32.partialorder %v1694_v38, 8.507059e+37 }
 0x6c7   :  { %v1673_v6 = vmul.f32 %v2143_v63, %v1672_v27  ;;  %v1525_v53 = vsub.f32 0.0, %v1499_v21 }
 0x6c9   :  { %v2145_v17 = vpop.eup %2144  ;;  %v1674_v14 = vadd.f32 %v2143_v63, %v1673_v6  ;;  %v1550_v30 = vmul.f32 1.442695, %v1525_v53 }
 0x6ca   :  { %v2147_v36 = vpop.eup %2146  ;;  %v1572_v40 = vadd.f32 1.0, %v2145_v17 }
 0x6cb   :  { %v1678_v22 = vsel %vm1677_vm7, %v2143_v63, %v1674_v14  ;;  %v1686_v48 = vmul.f32 %v2147_v36, %v1571_v8  ;;  %2148 = vpow2.f32 %v1550_v30  ;;  %vm1691_vm9 = vweird.f32 %v2147_v36 }
 0x6cc   :  { %v1683_v54 = vsel %vm1680_vm8, %v1682_v5, %v1678_v22  ;;  %2150 = vrcp.f32 %v1572_v40  ;;  %v1501_v9 = vpop.f32.mrf.mxu0  ;;  %vm1692_vm11 = vmor %vm1690_vm10, %vm1691_vm9  ;;  %v1711_v55 = vand.u32 2147483648, %v1572_v40  ;;  %v1709_v15 = vand.u32 2147483647, %v1572_v40 }
 0x6cd   :  { %1826 = vst [vmem:[%s3343_s21 + $0x30] sm:$0xff] %v1683_v54  ;;  %v1687_v32 = vsub.f32 1.0, %v1686_v48  ;;  %v1502_v42 = vadd.f32 %v3256_v13, %v1501_v9  ;;  %vm1705_vm14 = vweird.f32 %v1572_v40 }
 0x6ce   :  { %v1712_v20 = vor.u32 1.1754944e-38, %v1711_v55  ;;  %vm1710_vm0 = vcmp.eq.f32.partialorder %v1709_v15, 8.507059e+37 }
 0x6cf   :  { %v1688_v31 = vmul.f32 %v2147_v36, %v1687_v32  ;;  %v1526_v3 = vsub.f32 0.0, %v1502_v42 }
 0x6d1   :  { %v2149_v33 = vpop.eup %2148  ;;  %v1689_v12 = vadd.f32 %v2147_v36, %v1688_v31  ;;  %v1552_v47 = vmul.f32 1.442695, %v1526_v3 }
 0x6d2   :  { %v2151_v44 = vpop.eup %2150  ;;  %v1573_v25 = vadd.f32 1.0, %v2149_v33 }
 0x6d3   :  { %v1693_v4 = vsel %vm1692_vm11, %v2147_v36, %v1689_v12  ;;  %v1701_v58 = vmul.f32 %v2151_v44, %v1572_v40  ;;  %2152 = vpow2.f32 %v1552_v47  ;;  %vm1706_vm13 = vweird.f32 %v2151_v44 }
 0x6d4   :  { %v1698_v24 = vsel %vm1695_vm12, %v1697_v46, %v1693_v4  ;;  %2154 = vrcp.f32 %v1573_v25  ;;  %v1503_v49 = vpop.f32.mrf.mxu0  ;;  %vm1707_vm15 = vmor %vm1705_vm14, %vm1706_vm13  ;;  %v1726_v62 = vand.u32 2147483648, %v1573_v25  ;;  %v1724_v60 = vand.u32 2147483647, %v1573_v25 }
 0x6d5   :  { %1827 = vst [vmem:[%s3343_s21 + $0x38] sm:$0xff] %v1698_v24  ;;  %v1702_v56 = vsub.f32 1.0, %v1701_v58  ;;  %v1504_v45 = vadd.f32 %v3256_v13, %v1503_v49  ;;  %vm1720_vm2 = vweird.f32 %v1573_v25 }
 0x6d6   :  { %v1727_v8 = vor.u32 1.1754944e-38, %v1726_v62  ;;  %vm1725_vm4 = vcmp.eq.f32.partialorder %v1724_v60, 8.507059e+37 }
 0x6d7   :  { %v1703_v61 = vmul.f32 %v2151_v44, %v1702_v56  ;;  %v1527_v57 = vsub.f32 0.0, %v1504_v45 }
 0x6d9   :  { %v2153_v26 = vpop.eup %2152  ;;  %v1704_v50 = vadd.f32 %v2151_v44, %v1703_v61  ;;  %v1554_v11 = vmul.f32 1.442695, %v1527_v57 }
 0x6da   :  { %v2155_v2 = vpop.eup %2154  ;;  %v1574_v28 = vadd.f32 1.0, %v2153_v26 }
 0x6db   :  { %v1708_v35 = vsel %vm1707_vm15, %v2151_v44, %v1704_v50  ;;  %v1716_v37 = vmul.f32 %v2155_v2, %v1573_v25  ;;  %2156 = vpow2.f32 %v1554_v11  ;;  %vm1721_vm1 = vweird.f32 %v2155_v2 }
 0x6dc   :  { %v1713_v51 = vsel %vm1710_vm0, %v1712_v20, %v1708_v35  ;;  %2158 = vrcp.f32 %v1574_v28  ;;  %v1506_v29 = vpop.f32.mrf.mxu0  ;;  %vm1722_vm3 = vmor %vm1720_vm2, %vm1721_vm1  ;;  %v1741_v6 = vand.u32 2147483648, %v1574_v28  ;;  %v1739_v53 = vand.u32 2147483647, %v1574_v28 }
 0x6dd   :  { %1828 = vst [vmem:[%s3343_s21 + $0x40] sm:$0xff] %v1713_v51  ;;  %v1717_v52 = vsub.f32 1.0, %v1716_v37  ;;  %v1507_v19 = vadd.f32 %v3256_v13, %v1506_v29  ;;  %vm1735_vm6 = vweird.f32 %v1574_v28 }
 0x6de   :  { %v1742_v40 = vor.u32 1.1754944e-38, %v1741_v6  ;;  %vm1740_vm8 = vcmp.eq.f32.partialorder %v1739_v53, 8.507059e+37 }
 0x6df   :  { %v1718_v43 = vmul.f32 %v2155_v2, %v1717_v52  ;;  %v1528_v41 = vsub.f32 0.0, %v1507_v19 }
 0x6e1   :  { %v2157_v18 = vpop.eup %2156  ;;  %v1719_v1 = vadd.f32 %v2155_v2, %v1718_v43  ;;  %v1556_v63 = vmul.f32 1.442695, %v1528_v41 }
 0x6e2   :  { %v2159_v59 = vpop.eup %2158  ;;  %v1575_v16 = vadd.f32 1.0, %v2157_v18 }
 0x6e3   :  { %v1723_v7 = vsel %vm1722_vm3, %v2155_v2, %v1719_v1  ;;  %v1731_v23 = vmul.f32 %v2159_v59, %v1574_v28  ;;  %2160 = vpow2.f32 %v1556_v63  ;;  %vm1736_vm5 = vweird.f32 %v2159_v59 }
 0x6e4   :  { %v1728_v10 = vsel %vm1725_vm4, %v1727_v8, %v1723_v7  ;;  %2162 = vrcp.f32 %v1575_v16  ;;  %v1508_v27 = vpop.f32.mrf.mxu0  ;;  %vm1737_vm7 = vmor %vm1735_vm6, %vm1736_vm5  ;;  %v1756_v31 = vand.u32 2147483648, %v1575_v16  ;;  %v1754_v3 = vand.u32 2147483647, %v1575_v16 }
 0x6e5   :  { %1829 = vst [vmem:[%s3343_s21 + $0x48] sm:$0xff] %v1728_v10  ;;  %v1732_v21 = vsub.f32 1.0, %v1731_v23  ;;  %v1509_v0 = vadd.f32 %v3256_v13, %v1508_v27  ;;  %vm1750_vm10 = vweird.f32 %v1575_v16 }
 0x6e6   :  { %v1757_v25 = vor.u32 1.1754944e-38, %v1756_v31  ;;  %vm1755_vm12 = vcmp.eq.f32.partialorder %v1754_v3, 8.507059e+37 }
 0x6e7   :  { %v1733_v39 = vmul.f32 %v2159_v59, %v1732_v21  ;;  %v1529_v17 = vsub.f32 0.0, %v1509_v0 }
 0x6e9   :  { %v2161_v14 = vpop.eup %2160  ;;  %v1734_v30 = vadd.f32 %v2159_v59, %v1733_v39  ;;  %v1558_v36 = vmul.f32 1.442695, %v1529_v17 }
 0x6ea   :  { %v2163_v5 = vpop.eup %2162  ;;  %v1576_v22 = vadd.f32 1.0, %v2161_v14 }
 0x6eb   :  { %v1738_v48 = vsel %vm1737_vm7, %v2159_v59, %v1734_v30  ;;  %v1746_v54 = vmul.f32 %v2163_v5, %v1575_v16  ;;  %2164 = vpow2.f32 %v1558_v36  ;;  %vm1751_vm9 = vweird.f32 %v2163_v5 }
 0x6ec   :  { %v1743_v9 = vsel %vm1740_vm8, %v1742_v40, %v1738_v48  ;;  %2166 = vrcp.f32 %v1576_v22  ;;  %v1511_v32 = vpop.f32.mrf.mxu0  ;;  %vm1752_vm11 = vmor %vm1750_vm10, %vm1751_vm9  ;;  %v1771_v61 = vand.u32 2147483648, %v1576_v22  ;;  %v1769_v57 = vand.u32 2147483647, %v1576_v22 }
 0x6ed   :  { %1830 = vst [vmem:[%s3343_s21 + $0x50] sm:$0xff] %v1743_v9  ;;  %v1747_v42 = vsub.f32 1.0, %v1746_v54  ;;  %v1512_v34 = vadd.f32 %v3256_v13, %v1511_v32  ;;  %vm1765_vm14 = vweird.f32 %v1576_v22 }
 0x6ee   :  { %v1772_v28 = vor.u32 1.1754944e-38, %v1771_v61  ;;  %vm1770_vm0 = vcmp.eq.f32.partialorder %v1769_v57, 8.507059e+37 }
 0x6ef   :  { %v1748_v38 = vmul.f32 %v2163_v5, %v1747_v42  ;;  %v1530_v33 = vsub.f32 0.0, %v1512_v34 }
 0x6f1   :  { %v2165_v12 = vpop.eup %2164  ;;  %v1749_v47 = vadd.f32 %v2163_v5, %v1748_v38  ;;  %v1560_v44 = vmul.f32 1.442695, %v1530_v33 }
 0x6f2   :  { %v2167_v46 = vpop.eup %2166  ;;  %v1577_v4 = vadd.f32 1.0, %v2165_v12 }
 0x6f3   :  { %v1753_v58 = vsel %vm1752_vm11, %v2163_v5, %v1749_v47  ;;  %v1761_v24 = vmul.f32 %v2167_v46, %v1576_v22  ;;  %2168 = vpow2.f32 %v1560_v44  ;;  %vm1766_vm13 = vweird.f32 %v2167_v46 }
 0x6f4   :  { %v1758_v49 = vsel %vm1755_vm12, %v1757_v25, %v1753_v58  ;;  %2170 = vrcp.f32 %v1577_v4  ;;  %v1513_v56 = vpop.f32.mrf.mxu0  ;;  %vm1767_vm15 = vmor %vm1765_vm14, %vm1766_vm13  ;;  %v1786_v52 = vand.u32 2147483648, %v1577_v4  ;;  %v1784_v62 = vand.u32 2147483647, %v1577_v4 }
 0x6f5   :  { %1831 = vst [vmem:[%s3343_s21 + $0x58] sm:$0xff] %v1758_v49  ;;  %v1762_v45 = vsub.f32 1.0, %v1761_v24  ;;  %v1514_v55 = vadd.f32 %v3256_v13, %v1513_v56  ;;  %vm1780_vm2 = vweird.f32 %v1577_v4 }
 0x6f6   :  { %v1787_v18 = vor.u32 1.1754944e-38, %v1786_v52  ;;  %vm1785_vm4 = vcmp.eq.f32.partialorder %v1784_v62, 8.507059e+37 }
 0x6f7   :  { %v1763_v15 = vmul.f32 %v2167_v46, %v1762_v45  ;;  %v1531_v26 = vsub.f32 0.0, %v1514_v55 }
 0x6f9   :  { %v2169_v50 = vpop.eup %2168  ;;  %v1764_v11 = vadd.f32 %v2167_v46, %v1763_v15  ;;  %v1562_v2 = vmul.f32 1.442695, %v1531_v26 }
 0x6fa   :  { %v2171_v20 = vpop.eup %2170  ;;  %v1578_v35 = vadd.f32 1.0, %v2169_v50 }
 0x6fb   :  { %v1768_v37 = vsel %vm1767_vm15, %v2167_v46, %v1764_v11  ;;  %v1776_v51 = vmul.f32 %v2171_v20, %v1577_v4  ;;  %2172 = vpow2.f32 %v1562_v2  ;;  %vm1781_vm1 = vweird.f32 %v2171_v20 }
 0x6fc   :  { %v1773_v29 = vsel %vm1770_vm0, %v1772_v28, %v1768_v37  ;;  %2174 = vrcp.f32 %v1578_v35  ;;  %vm1782_vm3 = vmor %vm1780_vm2, %vm1781_vm1  ;;  %v1801_v7 = vand.u32 2147483648, %v1578_v35  ;;  %v1799_v10 = vand.u32 2147483647, %v1578_v35 }
 0x6fd   :  { %1832 = vst [vmem:[%s3343_s21 + $0x60] sm:$0xff] %v1773_v29  ;;  %v1777_v13 = vsub.f32 1.0, %v1776_v51  ;;  %vm1795_vm6 = vweird.f32 %v1578_v35 }
 0x6fe   :  { %v1802_v0 = vor.u32 1.1754944e-38, %v1801_v7  ;;  %vm1800_vm8 = vcmp.eq.f32.partialorder %v1799_v10, 8.507059e+37 }
 0x6ff   :  { %v1778_v19 = vmul.f32 %v2171_v20, %v1777_v13 }
 0x701   :  { %v2173_v43 = vpop.eup %2172  ;;  %v1779_v60 = vadd.f32 %v2171_v20, %v1778_v19 }
 0x702   :  { %v2175_v41 = vpop.eup %2174  ;;  %v1579_v1 = vadd.f32 1.0, %v2173_v43 }
 0x703   :  { %v1783_v63 = vsel %vm1782_vm3, %v2171_v20, %v1779_v60  ;;  %v1791_v59 = vmul.f32 %v2175_v41, %v1578_v35  ;;  %vm1796_vm5 = vweird.f32 %v2175_v41 }
 0x704   :  { %v1788_v8 = vsel %vm1785_vm4, %v1787_v18, %v1783_v63  ;;  %2176 = vrcp.f32 %v1579_v1  ;;  %vm1797_vm7 = vmor %vm1795_vm6, %vm1796_vm5  ;;  %v1816_v14 = vand.u32 2147483648, %v1579_v1  ;;  %v1814_v36 = vand.u32 2147483647, %v1579_v1 }
 0x705   :  { %1833 = vst [vmem:[%s3343_s21 + $0x68] sm:$0xff] %v1788_v8  ;;  %v1792_v16 = vsub.f32 1.0, %v1791_v59  ;;  %vm1810_vm10 = vweird.f32 %v1579_v1 }
 0x706   :  { %v1817_v40 = vor.u32 1.1754944e-38, %v1816_v14  ;;  %vm1815_vm12 = vcmp.eq.f32.partialorder %v1814_v36, 8.507059e+37 }
 0x707   :  { %v1793_v23 = vmul.f32 %v2175_v41, %v1792_v16 }
 0x709   :  { %v1794_v27 = vadd.f32 %v2175_v41, %v1793_v23 }
 0x70a   :  { %v2177_v21 = vpop.eup %2176 }
 0x70b   :  { %v1798_v6 = vsel %vm1797_vm7, %v2175_v41, %v1794_v27  ;;  %v1806_v39 = vmul.f32 %v2177_v21, %v1579_v1  ;;  %vm1811_vm9 = vweird.f32 %v2177_v21 }
 0x70c   :  { %v1803_v53 = vsel %vm1800_vm8, %v1802_v0, %v1798_v6  ;;  %vm1812_vm11 = vmor %vm1810_vm10, %vm1811_vm9 }
 0x70d   :  { %1834 = vst [vmem:[%s3343_s21 + $0x70] sm:$0xff] %v1803_v53  ;;  %v1807_v17 = vsub.f32 1.0, %v1806_v39 }
 0x70f   :  { %v1808_v30 = vmul.f32 %v2177_v21, %v1807_v17 }
 0x711   :  { %v1809_v5 = vadd.f32 %v2177_v21, %v1808_v30 }
 0x713   :  { %v1813_v22 = vsel %vm1812_vm11, %v2177_v21, %v1809_v5 }
 0x714   :  { %v1818_v48 = vsel %vm1815_vm12, %v1817_v40, %v1813_v22 }
 0x715   :  { %1835 = vst [vmem:[%s3343_s21 + $0x78] sm:$0xff] %v1818_v48 }

</bundles_post_ra>
